<compile_context>
chip_gen: v7x
topology: tpu7x:2x2x1
jax: 0.10.0
libtpu: 0.0.40
codegen_flags: <defaults>
</compile_context>

<pallas_src>
import functools

import jax
import jax.numpy as jnp
from jax.experimental import pallas as pl
from jax.experimental.pallas import tpu as pltpu

_VMEM_LIMIT = None


def _vmem_limit_bytes():
    """Per-generation scoped VMEM budget (~3/4 of physical, capped at 96 MiB)."""
    global _VMEM_LIMIT
    if _VMEM_LIMIT is None:
        limit = 64 * 1024 * 1024
        try:
            cap = int(pltpu.get_tpu_info().vmem_capacity_bytes)
            limit = max(32 * 1024 * 1024, min((cap * 3) // 4, 96 * 1024 * 1024))
        except Exception:
            pass
        _VMEM_LIMIT = limit
    return _VMEM_LIMIT


def _round_up(x, m):
    return ((x + m - 1) // m) * m


def _pick_tile(dim, cap, mult):
    """Largest tile <= cap that divides `dim` and is a multiple of `mult`;
    falls back to the full dim (always a legal block)."""
    if dim <= cap:
        return dim
    t = (cap // mult) * mult
    while t >= mult:
        if dim % t == 0:
            return t
        t -= mult
    return dim


# ----------------------------- tiled linear ----------------------------------

def _linear_kernel(x_ref, w_ref, b_ref, o_ref, acc_ref, *, mm_dt):
    k = pl.program_id(2)

    @pl.when(k == 0)
    def _():
        acc_ref[...] = jnp.zeros_like(acc_ref)

    acc_ref[...] += jnp.dot(x_ref[...].astype(mm_dt), w_ref[...].astype(mm_dt),
                            preferred_element_type=jnp.float32)

    @pl.when(k == pl.num_programs(2) - 1)
    def _():
        o_ref[...] = (acc_ref[...] + b_ref[...].astype(jnp.float32)).astype(o_ref.dtype)


def linear_pallas(x2d, w_kn, bias, matmul_dtype=None):
    """y = x2d @ w_kn + bias, tiled over (M, N, K) with an f32 accumulator.

    M is padded to the row tile (256 for large M; dtype-aware sublane multiple
    otherwise) so the grid never falls back to odd divisors / full-M blocks.
    """
    M, K = x2d.shape
    Kb, Nf = w_kn.shape
    assert K == Kb
    mm_dt = matmul_dtype if matmul_dtype is not None else x2d.dtype
    sub = 16 if mm_dt == jnp.bfloat16 else 8           # bf16 packs 2 rows / sublane
    tm = 256 if M >= 256 else _round_up(M, sub)
    Mp = _round_up(M, tm)
    if Mp != M:
        x2d = jnp.pad(x2d, ((0, Mp - M), (0, 0)))
    tn = _pick_tile(Nf, 256, 128)
    tk = _pick_tile(K, 512, 128)
    grid = (Mp // tm, Nf // tn, K // tk)
    out = pl.pallas_call(
        functools.partial(_linear_kernel, mm_dt=mm_dt),
        out_shape=jax.ShapeDtypeStruct((Mp, Nf), x2d.dtype),
        grid_spec=pltpu.PrefetchScalarGridSpec(
            num_scalar_prefetch=0,
            grid=grid,
            in_specs=[
                pl.BlockSpec((tm, tk), lambda i, j, k: (i, k)),
                pl.BlockSpec((tk, tn), lambda i, j, k: (k, j)),
                pl.BlockSpec((1, tn), lambda i, j, k: (0, j)),
            ],
            out_specs=pl.BlockSpec((tm, tn), lambda i, j, k: (i, j)),
            scratch_shapes=[pltpu.VMEM((tm, tn), jnp.float32)],
        ),
        compiler_params=pltpu.CompilerParams(
            dimension_semantics=("parallel", "parallel", "arbitrary"),
            vmem_limit_bytes=_vmem_limit_bytes()),
    )(x2d, w_kn, bias.reshape(1, Nf))
    return out[:M] if Mp != M else out


# ----------------------------- prefix attention core --------------------------

def _prefix_attn_kernel(q_ref, k_ref, v_ref, kp_ref, vp_ref, bias_ref, mask_ref,
                        o_ref, *, scale, mm_dt):
    """One (batch, q-tile) step over ALL heads; lane-dense (tq, C) output store.

    q_ref    : (1, H, tq, Dh)   query tile (all heads)
    k_ref    : (1, H, N, Dh)    full-sequence keys   (resident across q-tiles)
    v_ref    : (1, H, N, Dh)    full-sequence values (resident across q-tiles)
    kp_ref   : (H, P, Dh)       prefix key prompts   (batch-invariant)
    vp_ref   : (H, P, Dh)       prefix value prompts (batch-invariant)
    bias_ref : (H, tq, P+N)     relative position bias, prefix columns pre-zeroed
    mask_ref : (1, 1, P+N)      additive key mask: 0 keep / -1e30 drop (prefix=0)
    o_ref    : (1, tq, C)
    """
    H = q_ref.shape[1]

    # scale the whole q block once (not per head)
    q = (q_ref[0].astype(jnp.float32) * scale).astype(mm_dt)                   # (H, tq, Dh)

    # merge prefix + sequence K/V in VMEM (sublane-axis concat): one score
    # matmul, one PV matmul, one softmax stream -- no degenerate K=P matmul.
    k_full = jnp.concatenate([kp_ref[...].astype(mm_dt),
                              k_ref[0].astype(mm_dt)], axis=1)                 # (H, P+N, Dh)
    v_full = jnp.concatenate([vp_ref[...].astype(mm_dt),
                              v_ref[0].astype(mm_dt)], axis=1)                 # (H, P+N, Dh)

    s = jnp.einsum("hqd,hkd->hqk", q, k_full,
                   preferred_element_type=jnp.float32)                         # (H, tq, P+N)
    s = s + bias_ref[...].astype(jnp.float32) + mask_ref[...].astype(jnp.float32)

    m = jnp.max(s, axis=-1, keepdims=True)
    p = jnp.exp(s - m)
    inv = pl.reciprocal(jnp.sum(p, axis=-1, keepdims=True), approx=True)        # EUP slot
    p = (p * inv).astype(mm_dt)                                                 # softmax(...).type_as(x)

    out = jnp.einsum("hqk,hkd->hqd", p, v_full,
                     preferred_element_type=jnp.float32)                        # (H, tq, Dh)

    # Fold heads into the channel dim -> single lane-dense (tq, C) store.
    # TODO(synk): replace the per-head lane concat with a single layout-aware
    # reshape (pltpu.einshape) once its grouping grammar is verified on Mosaic.
    o_ref[0] = jnp.concatenate([out[h] for h in range(H)], axis=-1).astype(o_ref.dtype)


def prefix_attention_core_pallas(q, k, v, key_prompts, val_prompts, bias_ext,
                                 mask_add, *, scale, matmul_dtype=None):
    B, H, N, Dh = q.shape
    P = key_prompts.shape[1]
    M = P + N
    C = H * Dh
    mm_dt = matmul_dtype if matmul_dtype is not None else q.dtype

    # query-tile grid axis: keeps (H, tq, P+N) tiles within v7x's 64 MiB VMEM
    # and gives the megacore / 2 TCs more than B parallel steps.
    tq = N if N <= 256 else _pick_tile(N, 256, 8)
    grid = (B, N // tq)

    # TODO(synk): batch-invariant operands (kp/vp/bias) could be single-buffered
    # via pipeline_mode=pl.Buffered(1) to halve their VMEM residency.
    return pl.pallas_call(
        functools.partial(_prefix_attn_kernel, scale=scale, mm_dt=mm_dt),
        out_shape=jax.ShapeDtypeStruct((B, N, C), q.dtype),
        grid=grid,
        in_specs=[
            pl.BlockSpec((1, H, tq, Dh), lambda b, qi: (b, 0, qi, 0)),
            pl.BlockSpec((1, H, N, Dh), lambda b, qi: (b, 0, 0, 0)),   # K resident across q-tiles
            pl.BlockSpec((1, H, N, Dh), lambda b, qi: (b, 0, 0, 0)),   # V resident across q-tiles
            pl.BlockSpec((H, P, Dh), lambda b, qi: (0, 0, 0)),         # shared across batch
            pl.BlockSpec((H, P, Dh), lambda b, qi: (0, 0, 0)),         # shared across batch
            pl.BlockSpec((H, tq, M), lambda b, qi: (0, qi, 0)),        # shared across batch
            pl.BlockSpec((1, 1, M), lambda b, qi: (b, 0, 0)),
        ],
        out_specs=pl.BlockSpec((1, tq, C), lambda b, qi: (b, qi, 0)),
        compiler_params=pltpu.CompilerParams(
            dimension_semantics=("parallel", "parallel"),
            vmem_limit_bytes=_vmem_limit_bytes()),
    )(q, k, v, key_prompts, val_prompts, bias_ext, mask_add)


# ----------------------------- param prep & forward ----------------------------

def prepare_params(torch_params, *, num_heads, reparameterization=True):
    """One-time param prep (outside jit): weight transposes, qkv bias concat and
    the (input-independent) prompt projection are all amortised to zero."""
    C = torch_params["qkv_w"].shape[1]
    H = num_heads
    Dh = C // H
    p = {
        "qkv_w_t": torch_params["qkv_w"].T,          # (C, 3C)
        "proj_w_t": torch_params["proj_w"].T,        # (C, C)
        "proj_b": torch_params["proj_b"],
        "qkv_bias": jnp.concatenate([torch_params["q_bias"],
                                     jnp.zeros_like(torch_params["v_bias"]),
                                     torch_params["v_bias"]]),
    }
    embed = torch_params["prompt_embed"]             # (P, C) or (P, 2C)
    if reparameterization:
        h = jnp.tanh(embed @ torch_params["pp_w1"].T + torch_params["pp_b1"])
        prompts = h @ torch_params["pp_w2"].T + torch_params["pp_b2"]    # (P, 2C)
    else:
        prompts = embed
    P = prompts.shape[0]
    # NOTE: this reshape mirrors torch's (B, P, C).reshape(B, H, P, Dh)
    # linearization (prefix tokens interleaved across heads), by design.
    p["key_prompts"] = prompts[:, :C].reshape(H, P, Dh)
    p["val_prompts"] = prompts[:, C:].reshape(H, P, Dh)
    return p


def prefix_attention_forward(x, params, mask, relative_position_bias, *,
                             num_heads, prefix_length, matmul_dtype=None):
    """Pallas implementation of PrefixAttention.forward (qkv_bias=True, dropout=0).

    matmul_dtype=jnp.bfloat16 keeps f32 accumulation but runs MXU operands in
    bf16 (recommended default on v5e)."""
    B, N, C = x.shape
    H = num_heads
    Dh = C // H
    P = prefix_length
    scale = Dh ** (-0.5)

    # qkv = F.linear(x, qkv.weight, cat(q_bias, zeros, v_bias))
    qkv = linear_pallas(x.reshape(B * N, C), params["qkv_w_t"], params["qkv_bias"],
                        matmul_dtype)                                   # (B*N, 3C)
    # one fused XLA transpose to a head-major layout (done once; the attention
    # kernel then never re-slices lane-misaligned Dh columns per q-tile)
    qkv = qkv.reshape(B, N, 3, H, Dh).transpose(2, 0, 3, 1, 4)          # (3, B, H, N, Dh)
    q, k, v = qkv[0], qkv[1], qkv[2]

    # batch-invariant zero-padded bias over prefix columns; additive key mask
    bias_ext = jnp.concatenate(
        [jnp.zeros((H, N, P), relative_position_bias.dtype), relative_position_bias],
        axis=-1)                                                        # (H, N, P+N)
    mask_add = jnp.concatenate(
        [jnp.zeros((B, P), jnp.float32),
         jnp.where(mask > 0.5, 0.0, -1e30).astype(jnp.float32)],
        axis=-1).reshape(B, 1, P + N)                                   # (B, 1, P+N)

    attn_out = prefix_attention_core_pallas(
        q, k, v, params["key_prompts"], params["val_prompts"], bias_ext, mask_add,
        scale=scale, matmul_dtype=matmul_dtype)                         # (B, N, C)

    out = linear_pallas(attn_out.reshape(B * N, C), params["proj_w_t"],
                        params["proj_b"], matmul_dtype)
    return out.reshape(B, N, C)


# ----------------------------- pure-JAX reference ------------------------------

def prefix_attention_reference(x, params, mask, relative_position_bias, *,
                               num_heads, prefix_length):
    B, N, C = x.shape
    H, Dh, P = num_heads, C // num_heads, prefix_length
    scale = Dh ** (-0.5)
    qkv_bias = jnp.concatenate(
        [params["q_bias"], jnp.zeros_like(params["v_bias"]), params["v_bias"]])
    qkv = x @ params["qkv_w"].T + qkv_bias
    qkv = qkv.reshape(B, N, 3, H, Dh).transpose(2, 0, 3, 1, 4)
    q, k, v = qkv[0], qkv[1], qkv[2]
    prompts = jnp.tanh(params["prompt_embed"] @ params["pp_w1"].T + params["pp_b1"])
    prompts = prompts @ params["pp_w2"].T + params["pp_b2"]
    prompts_b = jnp.broadcast_to(prompts[None], (B, P, 2 * C))
    kp = prompts_b[..., :C].reshape(B, H, P, Dh)
    vp = prompts_b[..., C:].reshape(B, H, P, Dh)
    k = jnp.concatenate([kp, k], axis=2)
    v = jnp.concatenate([vp, v], axis=2)
    q = q * scale
    attn = jnp.einsum("bhnd,bhmd->bhnm", q.astype(jnp.float32), k.astype(jnp.float32))
    rel = jnp.concatenate(
        [jnp.zeros((H, N, P), relative_position_bias.dtype), relative_position_bias],
        axis=-1)
    attn = attn + rel[None]
    mask_ext = jnp.concatenate([jnp.ones((B, P), mask.dtype), mask], axis=-1) > 0.5
    attn = jnp.where(mask_ext[:, None, None, :], attn, -jnp.inf)
    attn = jax.nn.softmax(attn, axis=-1).astype(x.dtype)
    out = jnp.einsum("bhnm,bhmd->bhnd", attn, v)
    out = out.transpose(0, 2, 1, 3).reshape(B, N, C)
    return out @ params["proj_w"].T + params["proj_b"]


# ----------------------------------- main --------------------------------------

if __name__ == "__main__":
    B, N, C = 2, 8, 32
    H = 4
    P = 4   # prefix_length

    key = jax.random.PRNGKey(0)
    keys = jax.random.split(key, 12)

    def rnd(k, shape, s=0.05):
        return jax.random.normal(k, shape, dtype=jnp.float32) * s

    # torch-layout params (nn.Linear weights are (out, in))
    params = {
        "qkv_w": rnd(keys[0], (3 * C, C)),
        "q_bias": rnd(keys[1], (C,)),
        "v_bias": rnd(keys[2], (C,)),
        "proj_w": rnd(keys[3], (C, C)),
        "proj_b": rnd(keys[4], (C,)),
        "prompt_embed": rnd(keys[5], (P, C)),
        "pp_w1": rnd(keys[6], (C, C)),
        "pp_b1": rnd(keys[7], (C,)),
        "pp_w2": rnd(keys[8], (2 * C, C)),
        "pp_b2": rnd(keys[9], (2 * C,)),
    }
    prepped = prepare_params(params, num_heads=H, reparameterization=True)

    x = jax.random.normal(keys[10], (B, N, C), dtype=jnp.float32)
    # padding mask over the original sequence (1 = keep); prefix tokens always kept
    mask = (jax.random.uniform(keys[11], (B, N)) > 0.2).astype(jnp.float32)
    rel_pos_bias = rnd(jax.random.PRNGKey(42), (H, N, N), s=0.1)

    # f32 path (matches the PyTorch module numerics up to the approx reciprocal)
    fwd = jax.jit(functools.partial(prefix_attention_forward, num_heads=H,
                                    prefix_length=P))
    out = jax.block_until_ready(fwd(x, prepped, mask, rel_pos_bias))

    ref = prefix_attention_reference(x, params, mask, rel_pos_bias,
                                     num_heads=H, prefix_length=P)
    assert out.shape == (B, N, C)
    assert jnp.allclose(out, ref, atol=2e-3, rtol=2e-3), \
        f"max diff {jnp.max(jnp.abs(out - ref))}"

    # bf16-operand path (v5e default recommendation / v6e-v7x MXU peak);
    # f32 accumulation, loose tolerance
    fwd_bf16 = jax.jit(functools.partial(prefix_attention_forward, num_heads=H,
                                         prefix_length=P,
                                         matmul_dtype=jnp.bfloat16))
    out_bf16 = jax.block_until_ready(fwd_bf16(x, prepped, mask, rel_pos_bias))
    assert jnp.allclose(out_bf16, ref, atol=5e-2, rtol=5e-2), \
        f"bf16 max diff {jnp.max(jnp.abs(out_bf16 - ref))}"

    print("KERNEL_OK")
</pallas_src>

<mosaic_0001>
module attributes {stable_mosaic.version = 11 : i64} {
  func.func @_linear_kernel(%arg0: i32, %arg1: i32, %arg2: i32, %arg3: memref<16x32xf32, #tpu.memory_space<vmem>>, %arg4: memref<32x96xf32, #tpu.memory_space<vmem>>, %arg5: memref<1x96xf32, #tpu.memory_space<vmem>>, %arg6: memref<16x96xf32, #tpu.memory_space<vmem>>, %arg7: memref<16x96xf32, #tpu.memory_space<vmem>>) attributes {dimension_semantics = [#tpu.dimension_semantics<parallel>, #tpu.dimension_semantics<parallel>, #tpu.dimension_semantics<arbitrary>], iteration_bounds = array<i64: 1, 1, 1>, scalar_prefetch = 0 : i64, scratch_operands = 1 : i64, tpu.core_type = #tpu.core_type<tc>, window_params = [{transform_indices = @transform_0, window_bounds = array<i64: 16, 32>}, {transform_indices = @transform_1, window_bounds = array<i64: 32, 96>}, {transform_indices = @transform_2, window_bounds = array<i64: 1, 96>}, {transform_indices = @transform_3, window_bounds = array<i64: 16, 96>}]} {
    %c0_i32 = arith.constant 0 : i32
    %0 = arith.cmpi eq, %arg2, %c0_i32 : i32
    %1 = arith.extui %0 : i1 to i32
    %c0_i32_0 = arith.constant 0 : i32
    %2 = arith.cmpi ne, %1, %c0_i32_0 : i32
    scf.if %2 {
      %cst_10 = arith.constant 0.000000e+00 : f32
      %12 = vector.broadcast %cst_10 : f32 to vector<16x96xf32>
      %c0_11 = arith.constant 0 : index
      %c0_12 = arith.constant 0 : index
      %13 = vector.load %arg7[%c0_11, %c0_12] : memref<16x96xf32, #tpu.memory_space<vmem>>, vector<16x96xf32>
      tpu.vector_store %arg7[%c0_11, %c0_12], %12 {strides = array<i32>} : memref<16x96xf32, #tpu.memory_space<vmem>>, vector<16x96xf32>,
    } else {
    }
    %c0 = arith.constant 0 : index
    %c0_1 = arith.constant 0 : index
    %3 = vector.load %arg7[%c0, %c0_1] : memref<16x96xf32, #tpu.memory_space<vmem>>, vector<16x96xf32>
    %c0_2 = arith.constant 0 : index
    %c0_3 = arith.constant 0 : index
    %4 = vector.load %arg3[%c0_2, %c0_3] : memref<16x32xf32, #tpu.memory_space<vmem>>, vector<16x32xf32>
    %c0_4 = arith.constant 0 : index
    %c0_5 = arith.constant 0 : index
    %5 = vector.load %arg4[%c0_4, %c0_5] : memref<32x96xf32, #tpu.memory_space<vmem>>, vector<32x96xf32>
    %cst = arith.constant dense<0.000000e+00> : vector<16x96xf32>
    %6 = tpu.matmul %4, %5, %cst {dimension_numbers = #tpu.dot_dimension_numbers<[1], [0], [0], [1], [0, 0, 1, 1], [], []>} : vector<16x32xf32>, vector<32x96xf32>, vector<16x96xf32> -> vector<16x96xf32>
    %7 = arith.addf %3, %6 : vector<16x96xf32>
    %c0_6 = arith.constant 0 : index
    %c0_7 = arith.constant 0 : index
    %8 = vector.load %arg7[%c0_6, %c0_7] : memref<16x96xf32, #tpu.memory_space<vmem>>, vector<16x96xf32>
    tpu.vector_store %arg7[%c0_6, %c0_7], %7 {strides = array<i32>} : memref<16x96xf32, #tpu.memory_space<vmem>>, vector<16x96xf32>,
    %c0_i32_8 = arith.constant 0 : i32
    %9 = arith.cmpi eq, %arg2, %c0_i32_8 : i32
    %10 = arith.extui %9 : i1 to i32
    %c0_i32_9 = arith.constant 0 : i32
    %11 = arith.cmpi ne, %10, %c0_i32_9 : i32
    scf.if %11 {
      %c0_10 = arith.constant 0 : index
      %c0_11 = arith.constant 0 : index
      %12 = vector.load %arg7[%c0_10, %c0_11] : memref<16x96xf32, #tpu.memory_space<vmem>>, vector<16x96xf32>
      %c0_12 = arith.constant 0 : index
      %c0_13 = arith.constant 0 : index
      %13 = vector.load %arg5[%c0_12, %c0_13] : memref<1x96xf32, #tpu.memory_space<vmem>>, vector<1x96xf32>
      %14 = vector.broadcast %13 : vector<1x96xf32> to vector<16x96xf32>
      %15 = arith.addf %12, %14 : vector<16x96xf32>
      %c0_14 = arith.constant 0 : index
      %c0_15 = arith.constant 0 : index
      %16 = vector.load %arg6[%c0_14, %c0_15] : memref<16x96xf32, #tpu.memory_space<vmem>>, vector<16x96xf32>
      tpu.vector_store %arg6[%c0_14, %c0_15], %15 {strides = array<i32>} : memref<16x96xf32, #tpu.memory_space<vmem>>, vector<16x96xf32>,
    } else {
    }
    return
  }
  func.func @transform_0(%arg0: i32, %arg1: i32, %arg2: i32) -> (i32, i32) {
    %c0_i32 = arith.constant 0 : i32
    return %arg0, %arg2 : i32, i32
  }
  func.func @transform_1(%arg0: i32, %arg1: i32, %arg2: i32) -> (i32, i32) {
    %c0_i32 = arith.constant 0 : i32
    return %arg2, %arg1 : i32, i32
  }
  func.func @transform_2(%arg0: i32, %arg1: i32, %arg2: i32) -> (i32, i32) {
    %c0_i32 = arith.constant 0 : i32
    %c0_i32_0 = arith.constant 0 : i32
    return %c0_i32, %arg1 : i32, i32
  }
  func.func @transform_3(%arg0: i32, %arg1: i32, %arg2: i32) -> (i32, i32) {
    %c0_i32 = arith.constant 0 : i32
    return %arg0, %arg1 : i32, i32
  }
}

module attributes {stable_mosaic.version = 11 : i64} {
  func.func @_linear_kernel(%arg0: i32, %arg1: i32, %arg2: i32, %arg3: memref<16x32xf32, #tpu.memory_space<vmem>>, %arg4: memref<32x32xf32, #tpu.memory_space<vmem>>, %arg5: memref<1x32xf32, #tpu.memory_space<vmem>>, %arg6: memref<16x32xf32, #tpu.memory_space<vmem>>, %arg7: memref<16x32xf32, #tpu.memory_space<vmem>>) attributes {dimension_semantics = [#tpu.dimension_semantics<parallel>, #tpu.dimension_semantics<parallel>, #tpu.dimension_semantics<arbitrary>], iteration_bounds = array<i64: 1, 1, 1>, scalar_prefetch = 0 : i64, scratch_operands = 1 : i64, tpu.core_type = #tpu.core_type<tc>, window_params = [{transform_indices = @transform_0, window_bounds = array<i64: 16, 32>}, {transform_indices = @transform_1, window_bounds = array<i64: 32, 32>}, {transform_indices = @transform_2, window_bounds = array<i64: 1, 32>}, {transform_indices = @transform_3, window_bounds = array<i64: 16, 32>}]} {
    %c0_i32 = arith.constant 0 : i32
    %0 = arith.cmpi eq, %arg2, %c0_i32 : i32
    %1 = arith.extui %0 : i1 to i32
    %c0_i32_0 = arith.constant 0 : i32
    %2 = arith.cmpi ne, %1, %c0_i32_0 : i32
    scf.if %2 {
      %cst_10 = arith.constant 0.000000e+00 : f32
      %12 = vector.broadcast %cst_10 : f32 to vector<16x32xf32>
      %c0_11 = arith.constant 0 : index
      %c0_12 = arith.constant 0 : index
      %13 = vector.load %arg7[%c0_11, %c0_12] : memref<16x32xf32, #tpu.memory_space<vmem>>, vector<16x32xf32>
      tpu.vector_store %arg7[%c0_11, %c0_12], %12 {strides = array<i32>} : memref<16x32xf32, #tpu.memory_space<vmem>>, vector<16x32xf32>,
    } else {
    }
    %c0 = arith.constant 0 : index
    %c0_1 = arith.constant 0 : index
    %3 = vector.load %arg7[%c0, %c0_1] : memref<16x32xf32, #tpu.memory_space<vmem>>, vector<16x32xf32>
    %c0_2 = arith.constant 0 : index
    %c0_3 = arith.constant 0 : index
    %4 = vector.load %arg3[%c0_2, %c0_3] : memref<16x32xf32, #tpu.memory_space<vmem>>, vector<16x32xf32>
    %c0_4 = arith.constant 0 : index
    %c0_5 = arith.constant 0 : index
    %5 = vector.load %arg4[%c0_4, %c0_5] : memref<32x32xf32, #tpu.memory_space<vmem>>, vector<32x32xf32>
    %cst = arith.constant dense<0.000000e+00> : vector<16x32xf32>
    %6 = tpu.matmul %4, %5, %cst {dimension_numbers = #tpu.dot_dimension_numbers<[1], [0], [0], [1], [0, 0, 1, 1], [], []>} : vector<16x32xf32>, vector<32x32xf32>, vector<16x32xf32> -> vector<16x32xf32>
    %7 = arith.addf %3, %6 : vector<16x32xf32>
    %c0_6 = arith.constant 0 : index
    %c0_7 = arith.constant 0 : index
    %8 = vector.load %arg7[%c0_6, %c0_7] : memref<16x32xf32, #tpu.memory_space<vmem>>, vector<16x32xf32>
    tpu.vector_store %arg7[%c0_6, %c0_7], %7 {strides = array<i32>} : memref<16x32xf32, #tpu.memory_space<vmem>>, vector<16x32xf32>,
    %c0_i32_8 = arith.constant 0 : i32
    %9 = arith.cmpi eq, %arg2, %c0_i32_8 : i32
    %10 = arith.extui %9 : i1 to i32
    %c0_i32_9 = arith.constant 0 : i32
    %11 = arith.cmpi ne, %10, %c0_i32_9 : i32
    scf.if %11 {
      %c0_10 = arith.constant 0 : index
      %c0_11 = arith.constant 0 : index
      %12 = vector.load %arg7[%c0_10, %c0_11] : memref<16x32xf32, #tpu.memory_space<vmem>>, vector<16x32xf32>
      %c0_12 = arith.constant 0 : index
      %c0_13 = arith.constant 0 : index
      %13 = vector.load %arg5[%c0_12, %c0_13] : memref<1x32xf32, #tpu.memory_space<vmem>>, vector<1x32xf32>
      %14 = vector.broadcast %13 : vector<1x32xf32> to vector<16x32xf32>
      %15 = arith.addf %12, %14 : vector<16x32xf32>
      %c0_14 = arith.constant 0 : index
      %c0_15 = arith.constant 0 : index
      %16 = vector.load %arg6[%c0_14, %c0_15] : memref<16x32xf32, #tpu.memory_space<vmem>>, vector<16x32xf32>
      tpu.vector_store %arg6[%c0_14, %c0_15], %15 {strides = array<i32>} : memref<16x32xf32, #tpu.memory_space<vmem>>, vector<16x32xf32>,
    } else {
    }
    return
  }
  func.func @transform_0(%arg0: i32, %arg1: i32, %arg2: i32) -> (i32, i32) {
    %c0_i32 = arith.constant 0 : i32
    return %arg0, %arg2 : i32, i32
  }
  func.func @transform_1(%arg0: i32, %arg1: i32, %arg2: i32) -> (i32, i32) {
    %c0_i32 = arith.constant 0 : i32
    return %arg2, %arg1 : i32, i32
  }
  func.func @transform_2(%arg0: i32, %arg1: i32, %arg2: i32) -> (i32, i32) {
    %c0_i32 = arith.constant 0 : i32
    %c0_i32_0 = arith.constant 0 : i32
    return %c0_i32, %arg1 : i32, i32
  }
  func.func @transform_3(%arg0: i32, %arg1: i32, %arg2: i32) -> (i32, i32) {
    %c0_i32 = arith.constant 0 : i32
    return %arg0, %arg1 : i32, i32
  }
}

module attributes {stable_mosaic.version = 11 : i64} {
  func.func @_prefix_attn_kernel(%arg0: i32, %arg1: i32, %arg2: memref<1x4x8x8xf32, #tpu.memory_space<vmem>>, %arg3: memref<1x4x8x8xf32, #tpu.memory_space<vmem>>, %arg4: memref<1x4x8x8xf32, #tpu.memory_space<vmem>>, %arg5: memref<4x4x8xf32, #tpu.memory_space<vmem>>, %arg6: memref<4x4x8xf32, #tpu.memory_space<vmem>>, %arg7: memref<4x8x12xf32, #tpu.memory_space<vmem>>, %arg8: memref<1x1x12xf32, #tpu.memory_space<vmem>>, %arg9: memref<1x8x32xf32, #tpu.memory_space<vmem>>) attributes {dimension_semantics = [#tpu.dimension_semantics<parallel>, #tpu.dimension_semantics<parallel>], iteration_bounds = array<i64: 2, 1>, scalar_prefetch = 0 : i64, scratch_operands = 0 : i64, tpu.core_type = #tpu.core_type<tc>, window_params = [{transform_indices = @transform_0, window_bounds = array<i64: 1, 4, 8, 8>}, {transform_indices = @transform_1, window_bounds = array<i64: 1, 4, 8, 8>}, {transform_indices = @transform_2, window_bounds = array<i64: 1, 4, 8, 8>}, {pipeline_mode = #tpu.pipeline_mode<synchronous>, transform_indices = @transform_3, window_bounds = array<i64: 4, 4, 8>}, {pipeline_mode = #tpu.pipeline_mode<synchronous>, transform_indices = @transform_4, window_bounds = array<i64: 4, 4, 8>}, {transform_indices = @transform_5, window_bounds = array<i64: 4, 8, 12>}, {transform_indices = @transform_6, window_bounds = array<i64: 1, 1, 12>}, {transform_indices = @transform_7, window_bounds = array<i64: 1, 8, 32>}]} {
    %c0 = arith.constant 0 : index
    %c0_0 = arith.constant 0 : index
    %c0_1 = arith.constant 0 : index
    %c0_2 = arith.constant 0 : index
    %0 = vector.load %arg2[%c0, %c0_0, %c0_1, %c0_2] : memref<1x4x8x8xf32, #tpu.memory_space<vmem>>, vector<1x4x8x8xf32>
    %1 = vector.shape_cast %0 : vector<1x4x8x8xf32> to vector<4x8x8xf32>
    %cst = arith.constant 0.353553385 : f32
    %2 = vector.broadcast %cst : f32 to vector<4x8x8xf32>
    %3 = arith.mulf %1, %2 : vector<4x8x8xf32>
    %c0_3 = arith.constant 0 : index
    %c0_4 = arith.constant 0 : index
    %c0_5 = arith.constant 0 : index
    %4 = vector.load %arg5[%c0_3, %c0_4, %c0_5] : memref<4x4x8xf32, #tpu.memory_space<vmem>>, vector<4x4x8xf32>
    %c0_6 = arith.constant 0 : index
    %c0_7 = arith.constant 0 : index
    %c0_8 = arith.constant 0 : index
    %c0_9 = arith.constant 0 : index
    %5 = vector.load %arg3[%c0_6, %c0_7, %c0_8, %c0_9] : memref<1x4x8x8xf32, #tpu.memory_space<vmem>>, vector<1x4x8x8xf32>
    %6 = vector.shape_cast %5 : vector<1x4x8x8xf32> to vector<4x8x8xf32>
    %7 = tpu.concatenate %4, %6 in 1 : vector<4x4x8xf32>, vector<4x8x8xf32> -> vector<4x12x8xf32>
    %c0_10 = arith.constant 0 : index
    %c0_11 = arith.constant 0 : index
    %c0_12 = arith.constant 0 : index
    %8 = vector.load %arg6[%c0_10, %c0_11, %c0_12] : memref<4x4x8xf32, #tpu.memory_space<vmem>>, vector<4x4x8xf32>
    %c0_13 = arith.constant 0 : index
    %c0_14 = arith.constant 0 : index
    %c0_15 = arith.constant 0 : index
    %c0_16 = arith.constant 0 : index
    %9 = vector.load %arg4[%c0_13, %c0_14, %c0_15, %c0_16] : memref<1x4x8x8xf32, #tpu.memory_space<vmem>>, vector<1x4x8x8xf32>
    %10 = vector.shape_cast %9 : vector<1x4x8x8xf32> to vector<4x8x8xf32>
    %11 = tpu.concatenate %8, %10 in 1 : vector<4x4x8xf32>, vector<4x8x8xf32> -> vector<4x12x8xf32>
    "tpu.trace_start"() <{level = 10 : i32, message = "hqd,hkd->hqk"}> : () -> ()
    %cst_17 = arith.constant dense<0.000000e+00> : vector<4x8x12xf32>
    %12 = tpu.matmul %3, %7, %cst_17 {dimension_numbers = #tpu.dot_dimension_numbers<[2], [2], [1], [1], [0, 0, 0, 1, 1, 1], [0], [0]>} : vector<4x8x8xf32>, vector<4x12x8xf32>, vector<4x8x12xf32> -> vector<4x8x12xf32>
    "tpu.trace_stop"() : () -> ()
    %c0_18 = arith.constant 0 : index
    %c0_19 = arith.constant 0 : index
    %c0_20 = arith.constant 0 : index
    %13 = vector.load %arg7[%c0_18, %c0_19, %c0_20] : memref<4x8x12xf32, #tpu.memory_space<vmem>>, vector<4x8x12xf32>
    %14 = arith.addf %12, %13 : vector<4x8x12xf32>
    %c0_21 = arith.constant 0 : index
    %c0_22 = arith.constant 0 : index
    %c0_23 = arith.constant 0 : index
    %15 = vector.load %arg8[%c0_21, %c0_22, %c0_23] : memref<1x1x12xf32, #tpu.memory_space<vmem>>, vector<1x1x12xf32>
    %16 = vector.broadcast %15 : vector<1x1x12xf32> to vector<4x8x12xf32>
    %17 = arith.addf %14, %16 : vector<4x8x12xf32>
    %cst_24 = arith.constant dense<0xFF800000> : vector<4x8xf32>
    %18 = vector.multi_reduction <maximumf>, %17, %cst_24 [2] : vector<4x8x12xf32> to vector<4x8xf32>
    %19 = vector.shape_cast %18 : vector<4x8xf32> to vector<4x8x1xf32>
    %20 = vector.broadcast %19 : vector<4x8x1xf32> to vector<4x8x12xf32>
    %21 = arith.subf %17, %20 : vector<4x8x12xf32>
    %22 = math.exp %21 : vector<4x8x12xf32>
    %cst_25 = arith.constant dense<0.000000e+00> : vector<4x8xf32>
    %23 = vector.multi_reduction <add>, %22, %cst_25 [2] : vector<4x8x12xf32> to vector<4x8xf32>
    %24 = vector.shape_cast %23 : vector<4x8xf32> to vector<4x8x1xf32>
    %25 = tpu.reciprocal %24 {approx = true} : vector<4x8x1xf32> -> vector<4x8x1xf32>
    %26 = vector.broadcast %25 : vector<4x8x1xf32> to vector<4x8x12xf32>
    %27 = arith.mulf %22, %26 : vector<4x8x12xf32>
    "tpu.trace_start"() <{level = 10 : i32, message = "hqk,hkd->hqd"}> : () -> ()
    %cst_26 = arith.constant dense<0.000000e+00> : vector<4x8x8xf32>
    %28 = tpu.matmul %27, %11, %cst_26 {dimension_numbers = #tpu.dot_dimension_numbers<[2], [1], [1], [2], [0, 0, 0, 1, 1, 2], [0], [0]>} : vector<4x8x12xf32>, vector<4x12x8xf32>, vector<4x8x8xf32> -> vector<4x8x8xf32>
    "tpu.trace_stop"() : () -> ()
    %29 = vector.extract_strided_slice %28 {offsets = [0, 0, 0], sizes = [1, 8, 8], strides = [1, 1, 1]} : vector<4x8x8xf32> to vector<1x8x8xf32>
    %30 = vector.shape_cast %29 : vector<1x8x8xf32> to vector<8x8xf32>
    %31 = vector.extract_strided_slice %28 {offsets = [1, 0, 0], sizes = [1, 8, 8], strides = [1, 1, 1]} : vector<4x8x8xf32> to vector<1x8x8xf32>
    %32 = vector.shape_cast %31 : vector<1x8x8xf32> to vector<8x8xf32>
    %33 = vector.extract_strided_slice %28 {offsets = [2, 0, 0], sizes = [1, 8, 8], strides = [1, 1, 1]} : vector<4x8x8xf32> to vector<1x8x8xf32>
    %34 = vector.shape_cast %33 : vector<1x8x8xf32> to vector<8x8xf32>
    %35 = vector.extract_strided_slice %28 {offsets = [3, 0, 0], sizes = [1, 8, 8], strides = [1, 1, 1]} : vector<4x8x8xf32> to vector<1x8x8xf32>
    %36 = vector.shape_cast %35 : vector<1x8x8xf32> to vector<8x8xf32>
    %37 = tpu.concatenate %30, %32, %34, %36 in 1 : vector<8x8xf32>, vector<8x8xf32>, vector<8x8xf32>, vector<8x8xf32> -> vector<8x32xf32>
    %c0_27 = arith.constant 0 : index
    %c0_28 = arith.constant 0 : index
    %c0_29 = arith.constant 0 : index
    %38 = vector.load %arg9[%c0_27, %c0_28, %c0_29] : memref<1x8x32xf32, #tpu.memory_space<vmem>>, vector<1x8x32xf32>
    %39 = vector.shape_cast %38 : vector<1x8x32xf32> to vector<8x32xf32>
    %40 = vector.shape_cast %37 : vector<8x32xf32> to vector<1x8x32xf32>
    tpu.vector_store %arg9[%c0_27, %c0_28, %c0_29], %40 {strides = array<i32>} : memref<1x8x32xf32, #tpu.memory_space<vmem>>, vector<1x8x32xf32>,
    return
  }
  func.func @transform_0(%arg0: i32, %arg1: i32) -> (i32, i32, i32, i32) {
    %c0_i32 = arith.constant 0 : i32
    %c0_i32_0 = arith.constant 0 : i32
    %c0_i32_1 = arith.constant 0 : i32
    return %arg0, %c0_i32, %arg1, %c0_i32_0 : i32, i32, i32, i32
  }
  func.func @transform_1(%arg0: i32, %arg1: i32) -> (i32, i32, i32, i32) {
    %c0_i32 = arith.constant 0 : i32
    %c0_i32_0 = arith.constant 0 : i32
    %c0_i32_1 = arith.constant 0 : i32
    %c0_i32_2 = arith.constant 0 : i32
    return %arg0, %c0_i32, %c0_i32_0, %c0_i32_1 : i32, i32, i32, i32
  }
  func.func @transform_2(%arg0: i32, %arg1: i32) -> (i32, i32, i32, i32) {
    %c0_i32 = arith.constant 0 : i32
    %c0_i32_0 = arith.constant 0 : i32
    %c0_i32_1 = arith.constant 0 : i32
    %c0_i32_2 = arith.constant 0 : i32
    return %arg0, %c0_i32, %c0_i32_0, %c0_i32_1 : i32, i32, i32, i32
  }
  func.func @transform_3(%arg0: i32, %arg1: i32) -> (i32, i32, i32) {
    %c0_i32 = arith.constant 0 : i32
    %c0_i32_0 = arith.constant 0 : i32
    %c0_i32_1 = arith.constant 0 : i32
    %c0_i32_2 = arith.constant 0 : i32
    return %c0_i32, %c0_i32_0, %c0_i32_1 : i32, i32, i32
  }
  func.func @transform_4(%arg0: i32, %arg1: i32) -> (i32, i32, i32) {
    %c0_i32 = arith.constant 0 : i32
    %c0_i32_0 = arith.constant 0 : i32
    %c0_i32_1 = arith.constant 0 : i32
    %c0_i32_2 = arith.constant 0 : i32
    return %c0_i32, %c0_i32_0, %c0_i32_1 : i32, i32, i32
  }
  func.func @transform_5(%arg0: i32, %arg1: i32) -> (i32, i32, i32) {
    %c0_i32 = arith.constant 0 : i32
    %c0_i32_0 = arith.constant 0 : i32
    %c0_i32_1 = arith.constant 0 : i32
    return %c0_i32, %arg1, %c0_i32_0 : i32, i32, i32
  }
  func.func @transform_6(%arg0: i32, %arg1: i32) -> (i32, i32, i32) {
    %c0_i32 = arith.constant 0 : i32
    %c0_i32_0 = arith.constant 0 : i32
    %c0_i32_1 = arith.constant 0 : i32
    return %arg0, %c0_i32, %c0_i32_0 : i32, i32, i32
  }
  func.func @transform_7(%arg0: i32, %arg1: i32) -> (i32, i32, i32) {
    %c0_i32 = arith.constant 0 : i32
    %c0_i32_0 = arith.constant 0 : i32
    return %arg0, %arg1, %c0_i32 : i32, i32, i32
  }
}

</mosaic_0001>

<bundles_post_ra>
// kernel: prefix_attention_forward.3
= control target key start
LH: loop header
LB: loop body
LE: loop exit
PB: predicated region body
PF: predicated region fallthrough
CT: control target
= control target key end

     0   :  { %8 = vsyncpa [#allocation4], 0  ;;  %s416_s0 = inlined_call_operand.hbm [shape: f32[16,32], index: 0, kind: input, shape index: {}]   ;;  %s417_s1 = inlined_call_operand.hbm [shape: f32[32,96], index: 1, kind: input, shape index: {}]   ;;  %s418_s2 = inlined_call_operand.hbm [shape: f32[1,96], index: 2, kind: input, shape index: {}]   ;;  %s419_s3 = inlined_call_operand.hbm [shape: f32[16,96], index: 3, kind: output, shape index: {}]  }
   0x1   :  { %9 = vsyncpa [#allocation7], 0 }
   0x2   :  { %10 = vsyncpa [#allocation5], 0  ;;  %s319_s12 = smov [#allocation6]   ;;  %s320_s14 = smov [#allocation3]  }
   0x3   :  { %s28_s13 = sshll.u32 %s319_s12, 4  ;;  %s16_s15 = sshll.u32 %s320_s14, 4  ;;  %s29_s13 = int_to_ptr.vmem [resolvable:$true] %s28_s13  ;;  %s346_s15 = int_to_ptr.vmem [resolvable:$true] %s16_s15 }
   0x4   :  { %s225_s18 = scalar_lea.hbm %s417_s1, 512 }
   0x5   :  { %p226_p0 = scmp.ne.s32.totalorder %s417_s1, %s225_s18  ;;  %p229_p1 = scmp.lt.u32.totalorder %s225_s18, %s417_s1 }
   0x7   :  { %p231_p2 = pnand %p229_p1, %p226_p0 }
   0x9   :  { %234 = shalt.err (!%p231_p2)
}
   0xa   :  { %s235_s23 = scalar_lea.vmem %s29_s13, 512  ;;  %p240_p4 = scmp.lt.s32.totalorder %s29_s13, %s29_s13 }
   0xb   :  { %p236_p3 = scmp.ne.s32.totalorder %s29_s13, %s235_s23  ;;  %p241_p5 = scmp.lt.s32.totalorder %s235_s23, %s235_s23 }
   0xd   :  { %p242_p6 = por %p241_p5, %p240_p4 }
   0xf   :  { %p243_p7 = pnand %p242_p6, %p236_p3 }
  0x11   :  { %246 = shalt.err (!%p243_p7)
}
  0x12   :  { %s321_s24 = smov 128   ;;  %s322_s25 = smov 8  }
  0x13   :  { %34 = dma.hbm_to_vmem [thread:$0]  %s417_s1, 512, %s29_s13, [#allocation7], %s321_s24, %s321_s24, %s322_s25  }
  0x14   :  { %s247_s30 = scalar_lea.hbm %s416_s0, 256 }
  0x15   :  { %p248_p8 = scmp.ne.s32.totalorder %s416_s0, %s247_s30  ;;  %p251_p9 = scmp.lt.u32.totalorder %s247_s30, %s416_s0 }
  0x17   :  { %p253_p10 = pnand %p251_p9, %p248_p8 }
  0x19   :  { %256 = shalt.err (!%p253_p10)
}
  0x1a   :  { %s257_s8 = scalar_lea.vmem %s346_s15, 256  ;;  %p262_p12 = scmp.lt.s32.totalorder %s346_s15, %s346_s15 }
  0x1b   :  { %p258_p11 = scmp.ne.s32.totalorder %s346_s15, %s257_s8  ;;  %p263_p13 = scmp.lt.s32.totalorder %s257_s8, %s257_s8 }
  0x1d   :  { %p264_p0 = por %p263_p13, %p262_p12 }
  0x1f   :  { %p265_p1 = pnand %p264_p0, %p258_p11 }
  0x21   :  { %268 = shalt.err (!%p265_p1)
}
  0x22   :  { %22 = dma.hbm_to_vmem [thread:$0]  %s416_s0, 256, %s346_s15, [#allocation4], %s321_s24, %s321_s24, %s322_s25  }
  0x23   :  { %s323_s10 = smov [#allocation8]   ;;  %s269_s14 = scalar_lea.hbm %s418_s2, 16 }
  0x24   :  { %s41_s11 = sshll.u32 %s323_s10, 4  ;;  %p270_p2 = scmp.ne.s32.totalorder %s418_s2, %s269_s14  ;;  %s42_s11 = int_to_ptr.vmem [resolvable:$true] %s41_s11 }
  0x25   :  { %p273_p3 = scmp.lt.u32.totalorder %s269_s14, %s418_s2 }
  0x27   :  { %p275_p4 = pnand %p273_p3, %p270_p2 }
  0x29   :  { %278 = shalt.err (!%p275_p4)
}
  0x2a   :  { %s279_s20 = scalar_lea.vmem %s42_s11, 16  ;;  %s283_s0 = scalar_lea.vmem %s42_s11, 32 }
  0x2b   :  { %p280_p5 = scmp.ne.s32.totalorder %s42_s11, %s279_s20  ;;  %p284_p6 = scmp.lt.s32.totalorder %s42_s11, %s42_s11 }
  0x2c   :  { %p285_p7 = scmp.lt.s32.totalorder %s283_s0, %s279_s20 }
  0x2e   :  { %p286_p8 = por %p285_p7, %p284_p6 }
  0x30   :  { %p287_p9 = pnand %p286_p8, %p280_p5 }
  0x32   :  { %290 = shalt.err (!%p287_p9)
}
  0x33   :  { %44 = dma.hbm_to_vmem [thread:$0]  %s418_s2, 16, %s42_s11, [#allocation7]  }
  0x34   :  { %313 = dma.done.wait [#allocation4], 256  }
  0x35   :  { %314 = vsyncadd [#allocation4], 4294967040 }
  0x36   :  { %315 = dma.done.wait [#allocation7], 528  }
  0x37   :  { %316 = vsyncadd [#allocation7], 4294966768  ;;  %vm58_vm0 = vcmask 785408   ;;  %v324_v0 = vmov 0.0   ;;  %vm69_vm1 = vcmask 261120   ;;  %v65_v1 = vld [vmem:[#allocation6] sm:$0xff] }
  0x38   :  { %60 = vst.msk [vmem:[#allocation2 + $0x8] sm:$0xff] %vm58_vm0, %v324_v0  ;;  %59 = vst.msk [vmem:[#allocation2] sm:$0xff] %vm58_vm0, %v324_v0  ;;  %v66_v2 = vld [vmem:[#allocation6 + $0x8] sm:$0xff]  ;;  %v67_v3 = vld [vmem:[#allocation6 + $0x10] sm:$0xff]  ;;  %s325_s2 = smov [#allocation9]  }
  0x39   :  { %v210_v4 = vpack.c.bf16 %v66_v2, %v65_v1  ;;  %v68_v5 = vld [vmem:[#allocation6 + $0x18] sm:$0xff]  ;;  %v63_v6 = vld [vmem:[#allocation3] sm:$0xff]  ;;  %v192_v15 = vld [vmem:[#allocation8] ss:$0 sm:$0xff]  ;;  %s177_s22 = sshll.u32 %s325_s2, 4  ;;  %s178_s22 = int_to_ptr.vmem [resolvable:$true] %s177_s22 }
  0x3a   :  { %v214_v7 = vpack.c.bf16 %v68_v5, %v67_v3  ;;  %207 = vmatprep.mubr.msk.f32.mxu0 %vm69_vm1, %v63_v6  ;;  %v64_v8 = vld [vmem:[#allocation3 + $0x8] sm:$0xff]  ;;  %s291_s23 = scalar_lea.vmem %s178_s22, 256  ;;  %p296_p11 = scmp.lt.s32.totalorder %s178_s22, %s178_s22 }
  0x3b   :  { %211 = vmatprep.subr.bf16.mxu0 %v210_v4  ;;  %p292_p10 = scmp.ne.s32.totalorder %s178_s22, %s291_s23  ;;  %p297_p12 = scmp.lt.s32.totalorder %s291_s23, %s291_s23 }
  0x3c   :  { %213 = vmatpush3.bf16.msra.mxu0 %v210_v4 }
  0x3d   :  { %215 = vmatprep.subr.bf16.mxu0 %v214_v7  ;;  %p298_p13 = por %p297_p12, %p296_p11 }
  0x3f   :  { %v62_v9 = vld [vmem:[#allocation2 + $0x8] sm:$0xff]  ;;  %v61_v10 = vld [vmem:[#allocation2] sm:$0xff]  ;;  %p299_p0 = pnand %p298_p13, %p292_p10 }
  0x40   :  { %217 = vmatpush3.bf16.msra.mxu0 %v214_v7 }
  0x43   :  { %208 = vmatmul.mubr.msk.f32.vlgmr.msra.gmra.mrb[0].mxu0 %vm69_vm1, %v64_v8 }
 0x116   :  { %v209_v11 = vpop.f32.mrb[0].mxu0 }
 0x117   :  { %v152_v12 = vadd.f32 %v209_v11, %v62_v9  ;;  %v142_v13 = vpop.f32.mrb[1].mxu0 }
 0x118   :  { %v151_v14 = vadd.f32 %v142_v13, %v61_v10 }
 0x119   :  { %155 = vst.msk [vmem:[#allocation2 + $0x8] sm:$0xff] %vm58_vm0, %v152_v12 }
 0x11a   :  { %154 = vst.msk [vmem:[#allocation2] sm:$0xff] %vm58_vm0, %v151_v14 }
 0x120   :  { %v160_v16 = vld [vmem:[#allocation2 + $0x8] sm:$0xff] }
 0x121   :  { %v159_v17 = vld [vmem:[#allocation2] sm:$0xff]  ;;  %v169_v18 = vadd.f32 %v192_v15, %v160_v16 }
 0x122   :  { %v168_v19 = vadd.f32 %v192_v15, %v159_v17 }
 0x123   :  { %171 = vst.msk [vmem:[#allocation9 + $0x8] sm:$0xff] %vm58_vm0, %v169_v18 }
 0x124   :  { %170 = vst.msk [vmem:[#allocation9] sm:$0xff] %vm58_vm0, %v168_v19 }
 0x125   :  { %302 = shalt.err (!%p299_p0)
}
 0x126   :  { %s303_s28 = scalar_lea.hbm %s419_s3, 256 }
 0x127   :  { %p304_p1 = scmp.ne.s32.totalorder %s419_s3, %s303_s28  ;;  %p307_p2 = scmp.lt.u32.totalorder %s303_s28, %s419_s3 }
 0x129   :  { %p309_p3 = pnand %p307_p2, %p304_p1 }
 0x12b   :  { %312 = shalt.err (!%p309_p3)
}
 0x12c   :  { %183 = dma.vmem_to_hbm [thread:$0]  %s178_s22, 256, %s419_s3, [#allocation5], %s321_s24, %s321_s24, %s322_s25  }
 0x12d   :  { %317 = dma.done.wait [#allocation5], 256  }
 0x12e   :  { %318 = vsyncadd [#allocation5], 4294967040 }
 0x12f   :  { %187 = vsyncpa [#allocation4], 1 }
 0x130   :  { %188 = vsyncpa [#allocation7], 1 }
 0x131   :  { %189 = vsyncpa [#allocation5], 1 }

// kernel: prefix_attention_forward.5
= control target key start
LH: loop header
LB: loop body
LE: loop exit
PB: predicated region body
PF: predicated region fallthrough
CT: control target
= control target key end

     0   :  { %8 = vsyncpa [#allocation4], 0  ;;  %s417_s0 = inlined_call_operand.hbm [shape: f32[16,32], index: 0, kind: input, shape index: {}]   ;;  %s418_s1 = inlined_call_operand.hbm [shape: f32[32,32], index: 1, kind: input, shape index: {}]   ;;  %s419_s2 = inlined_call_operand.hbm [shape: f32[1,32], index: 2, kind: input, shape index: {}]   ;;  %s420_s3 = inlined_call_operand.hbm [shape: f32[16,32], index: 3, kind: output, shape index: {}]  }
   0x1   :  { %9 = vsyncpa [#allocation7], 0 }
   0x2   :  { %10 = vsyncpa [#allocation5], 0  ;;  %s318_s12 = smov [#allocation6]   ;;  %s319_s14 = smov [#allocation3]  }
   0x3   :  { %s28_s13 = sshll.u32 %s318_s12, 4  ;;  %s16_s15 = sshll.u32 %s319_s14, 4  ;;  %s29_s13 = int_to_ptr.vmem [resolvable:$true] %s28_s13  ;;  %s345_s15 = int_to_ptr.vmem [resolvable:$true] %s16_s15 }
   0x4   :  { %s224_s18 = scalar_lea.hbm %s418_s1, 512 }
   0x5   :  { %p225_p0 = scmp.ne.s32.totalorder %s418_s1, %s224_s18  ;;  %p228_p1 = scmp.lt.u32.totalorder %s224_s18, %s418_s1 }
   0x7   :  { %p230_p2 = pnand %p228_p1, %p225_p0 }
   0x9   :  { %233 = shalt.err (!%p230_p2)
}
   0xa   :  { %s234_s23 = scalar_lea.vmem %s29_s13, 512  ;;  %p239_p4 = scmp.lt.s32.totalorder %s29_s13, %s29_s13 }
   0xb   :  { %p235_p3 = scmp.ne.s32.totalorder %s29_s13, %s234_s23  ;;  %p240_p5 = scmp.lt.s32.totalorder %s234_s23, %s234_s23 }
   0xd   :  { %p241_p6 = por %p240_p5, %p239_p4 }
   0xf   :  { %p242_p7 = pnand %p241_p6, %p235_p3 }
  0x11   :  { %245 = shalt.err (!%p242_p7)
}
  0x12   :  { %s320_s24 = smov 128   ;;  %s321_s25 = smov 8  }
  0x13   :  { %34 = dma.hbm_to_vmem [thread:$0]  %s418_s1, 512, %s29_s13, [#allocation7], %s320_s24, %s320_s24, %s321_s25  }
  0x14   :  { %s246_s30 = scalar_lea.hbm %s417_s0, 256 }
  0x15   :  { %p247_p8 = scmp.ne.s32.totalorder %s417_s0, %s246_s30  ;;  %p250_p9 = scmp.lt.u32.totalorder %s246_s30, %s417_s0 }
  0x17   :  { %p252_p10 = pnand %p250_p9, %p247_p8 }
  0x19   :  { %255 = shalt.err (!%p252_p10)
}
  0x1a   :  { %s256_s8 = scalar_lea.vmem %s345_s15, 256  ;;  %p261_p12 = scmp.lt.s32.totalorder %s345_s15, %s345_s15 }
  0x1b   :  { %p257_p11 = scmp.ne.s32.totalorder %s345_s15, %s256_s8  ;;  %p262_p13 = scmp.lt.s32.totalorder %s256_s8, %s256_s8 }
  0x1d   :  { %p263_p0 = por %p262_p13, %p261_p12 }
  0x1f   :  { %p264_p1 = pnand %p263_p0, %p257_p11 }
  0x21   :  { %267 = shalt.err (!%p264_p1)
}
  0x22   :  { %22 = dma.hbm_to_vmem [thread:$0]  %s417_s0, 256, %s345_s15, [#allocation4], %s320_s24, %s320_s24, %s321_s25  }
  0x23   :  { %s322_s10 = smov [#allocation8]   ;;  %s268_s14 = scalar_lea.hbm %s419_s2, 16 }
  0x24   :  { %s41_s11 = sshll.u32 %s322_s10, 4  ;;  %p269_p2 = scmp.ne.s32.totalorder %s419_s2, %s268_s14  ;;  %s42_s11 = int_to_ptr.vmem [resolvable:$true] %s41_s11 }
  0x25   :  { %p272_p3 = scmp.lt.u32.totalorder %s268_s14, %s419_s2 }
  0x27   :  { %p274_p4 = pnand %p272_p3, %p269_p2 }
  0x29   :  { %277 = shalt.err (!%p274_p4)
}
  0x2a   :  { %s278_s20 = scalar_lea.vmem %s42_s11, 16  ;;  %s282_s0 = scalar_lea.vmem %s42_s11, 32 }
  0x2b   :  { %p279_p5 = scmp.ne.s32.totalorder %s42_s11, %s278_s20  ;;  %p283_p6 = scmp.lt.s32.totalorder %s42_s11, %s42_s11 }
  0x2c   :  { %p284_p7 = scmp.lt.s32.totalorder %s282_s0, %s278_s20 }
  0x2e   :  { %p285_p8 = por %p284_p7, %p283_p6 }
  0x30   :  { %p286_p9 = pnand %p285_p8, %p279_p5 }
  0x32   :  { %289 = shalt.err (!%p286_p9)
}
  0x33   :  { %44 = dma.hbm_to_vmem [thread:$0]  %s419_s2, 16, %s42_s11, [#allocation7]  }
  0x34   :  { %312 = dma.done.wait [#allocation4], 256  }
  0x35   :  { %313 = vsyncadd [#allocation4], 4294967040 }
  0x36   :  { %314 = dma.done.wait [#allocation7], 528  }
  0x37   :  { %315 = vsyncadd [#allocation7], 4294966768  ;;  %vm58_vm0 = vcmask 261120   ;;  %v323_v0 = vmov 0.0   ;;  %v65_v1 = vld [vmem:[#allocation6] sm:$0xff]  ;;  %v66_v2 = vld [vmem:[#allocation6 + $0x8] sm:$0xff] }
  0x38   :  { %60 = vst.msk [vmem:[#allocation2 + $0x8] sm:$0xff] %vm58_vm0, %v323_v0  ;;  %59 = vst.msk [vmem:[#allocation2] sm:$0xff] %vm58_vm0, %v323_v0  ;;  %v67_v3 = vld [vmem:[#allocation6 + $0x10] sm:$0xff]  ;;  %v209_v4 = vpack.c.bf16 %v66_v2, %v65_v1  ;;  %v68_v5 = vld [vmem:[#allocation6 + $0x18] sm:$0xff]  ;;  %s324_s2 = smov [#allocation9]  }
  0x39   :  { %v63_v6 = vld [vmem:[#allocation3] sm:$0xff]  ;;  %v213_v7 = vpack.c.bf16 %v68_v5, %v67_v3  ;;  %v64_v8 = vld [vmem:[#allocation3 + $0x8] sm:$0xff]  ;;  %v191_v15 = vld [vmem:[#allocation8] ss:$0 sm:$0xff]  ;;  %s176_s22 = sshll.u32 %s324_s2, 4  ;;  %s177_s22 = int_to_ptr.vmem [resolvable:$true] %s176_s22 }
  0x3a   :  { %206 = vmatprep.mubr.msk.f32.mxu0 %vm58_vm0, %v63_v6  ;;  %210 = vmatprep.subr.bf16.mxu0 %v209_v4  ;;  %s290_s23 = scalar_lea.vmem %s177_s22, 256  ;;  %p295_p11 = scmp.lt.s32.totalorder %s177_s22, %s177_s22 }
  0x3b   :  { %212 = vmatpush3.bf16.msra.mxu0 %v209_v4  ;;  %p291_p10 = scmp.ne.s32.totalorder %s177_s22, %s290_s23  ;;  %p296_p12 = scmp.lt.s32.totalorder %s290_s23, %s290_s23 }
  0x3c   :  { %214 = vmatprep.subr.bf16.mxu0 %v213_v7 }
  0x3d   :  { %p297_p13 = por %p296_p12, %p295_p11 }
  0x3f   :  { %216 = vmatpush3.bf16.msra.mxu0 %v213_v7  ;;  %v62_v9 = vld [vmem:[#allocation2 + $0x8] sm:$0xff]  ;;  %v61_v10 = vld [vmem:[#allocation2] sm:$0xff]  ;;  %p298_p0 = pnand %p297_p13, %p291_p10 }
  0x42   :  { %207 = vmatmul.mubr.msk.f32.vlgmr.msra.gmra.mrb[0].mxu0 %vm58_vm0, %v64_v8 }
 0x115   :  { %v208_v11 = vpop.f32.mrb[0].mxu0 }
 0x116   :  { %v152_v12 = vadd.f32 %v208_v11, %v62_v9  ;;  %v142_v13 = vpop.f32.mrb[1].mxu0 }
 0x117   :  { %v151_v14 = vadd.f32 %v142_v13, %v61_v10 }
 0x118   :  { %154 = vst.msk [vmem:[#allocation2 + $0x8] sm:$0xff] %vm58_vm0, %v152_v12 }
 0x119   :  { %153 = vst.msk [vmem:[#allocation2] sm:$0xff] %vm58_vm0, %v151_v14 }
 0x11f   :  { %v159_v16 = vld [vmem:[#allocation2 + $0x8] sm:$0xff] }
 0x120   :  { %v158_v17 = vld [vmem:[#allocation2] sm:$0xff]  ;;  %v168_v18 = vadd.f32 %v191_v15, %v159_v16 }
 0x121   :  { %v167_v19 = vadd.f32 %v191_v15, %v158_v17 }
 0x122   :  { %170 = vst.msk [vmem:[#allocation9 + $0x8] sm:$0xff] %vm58_vm0, %v168_v18 }
 0x123   :  { %169 = vst.msk [vmem:[#allocation9] sm:$0xff] %vm58_vm0, %v167_v19 }
 0x124   :  { %301 = shalt.err (!%p298_p0)
}
 0x125   :  { %s302_s28 = scalar_lea.hbm %s420_s3, 256 }
 0x126   :  { %p303_p1 = scmp.ne.s32.totalorder %s420_s3, %s302_s28  ;;  %p306_p2 = scmp.lt.u32.totalorder %s302_s28, %s420_s3 }
 0x128   :  { %p308_p3 = pnand %p306_p2, %p303_p1 }
 0x12a   :  { %311 = shalt.err (!%p308_p3)
}
 0x12b   :  { %182 = dma.vmem_to_hbm [thread:$0]  %s177_s22, 256, %s420_s3, [#allocation5], %s320_s24, %s320_s24, %s321_s25  }
 0x12c   :  { %316 = dma.done.wait [#allocation5], 256  }
 0x12d   :  { %317 = vsyncadd [#allocation5], 4294967040 }
 0x12e   :  { %186 = vsyncpa [#allocation4], 1 }
 0x12f   :  { %187 = vsyncpa [#allocation7], 1 }
 0x130   :  { %188 = vsyncpa [#allocation5], 1 }

// kernel: prefix_attention_forward.4
= control target key start
LH: loop header
LB: loop body
LE: loop exit
PB: predicated region body
PF: predicated region fallthrough
CT: control target
= control target key end

     0   :  { %s2555_s0 = inlined_call_operand.hbm [shape: f32[2,4,8,8], index: 0, kind: input, shape index: {}]   ;;  %s2556_s1 = inlined_call_operand.hbm [shape: f32[2,4,8,8], index: 1, kind: input, shape index: {}]   ;;  %s2557_s2 = inlined_call_operand.hbm [shape: f32[2,4,8,8], index: 2, kind: input, shape index: {}]   ;;  %s2558_s3 = inlined_call_operand.hbm [shape: f32[4,4,8], index: 3, kind: input, shape index: {}]   ;;  %s2559_s4 = inlined_call_operand.hbm [shape: f32[4,4,8], index: 4, kind: input, shape index: {}]   ;;  %s2560_s5 = inlined_call_operand.hbm [shape: f32[4,8,12], index: 5, kind: input, shape index: {}]   ;;  %s2561_s6 = inlined_call_operand.hbm [shape: f32[2,1,12], index: 6, kind: input, shape index: {}]   ;;  %s2562_s7 = inlined_call_operand.hbm [shape: f32[2,8,32], index: 7, kind: output, shape index: {}]  }
   0x1   :  { %2592 = sst [smem:[#allocation30_spill]] %s2555_s0 }
   0x2   :  { %2593 = sst [smem:[#allocation31_spill]] %s2556_s1 }
   0x3   :  { %2594 = sst [smem:[#allocation32_spill]] %s2558_s3 }
   0x4   :  { %2595 = sst [smem:[#allocation33_spill]] %s2562_s7 }
   0x5   :  { %12 = vsyncpa [#allocation3], 0 }
   0x6   :  { %14 = vsyncpa [#allocation3 + $0x1], 0 }
   0x7   :  { %15 = vsyncpa [#allocation6], 0 }
   0x8   :  { %17 = vsyncpa [#allocation6 + $0x1], 0 }
   0x9   :  { %18 = vsyncpa [#allocation9], 0 }
   0xa   :  { %19 = vsyncpa [#allocation12], 0 }
   0xb   :  { %20 = vsyncpa [#allocation4], 0 }
   0xc   :  { %22 = vsyncpa [#allocation4 + $0x1], 0  ;;  %s2072_s24 = smov 0   ;;  %s2074_s25 = smov 0  }
   0xd   :  { %s2076_s26 = smov 0   ;;  %s2078_s27 = smov 0  }
   0xe   :  { %s2080_s28 = smov 0   ;;  %s2082_s29 = smov 0  }
   0xf LB: > { %2596 = sst [smem:[#allocation21_spill]] %s1991_s24  ;;  %s2103_s30 = sadd.s32 4294967295, %s2011_s29   ;;  %s2011_s29 = sphi %s2082_s29, %s28_s29   ;;  %s2007_s28 = sphi %s2080_s28, %s2659_s28   ;;  %s2003_s27 = sphi %s2078_s27, %s2658_s27   ;;  %s1999_s26 = sphi %s2076_s26, %s2657_s26   ;;  %s1995_s25 = sphi %s2074_s25, %s2656_s25   ;;  %s1991_s24 = sphi %s2072_s24, %s2653_s24  }
  0x10   : > { %2597 = sst [smem:[#allocation22_spill]] %s1995_s25  ;;  %s1410_s8 = sadd.s32 4294967294, %s2011_s29  }
  0x11   : > { %2598 = sst [smem:[#allocation23_spill]] %s2003_s27  ;;  %p56_p0 = scmp.ne.s32.totalorder %s1999_s26, %s1995_s25 }
  0x12   : > { %2599 = sst [smem:[#allocation24_spill]] %s2011_s29  ;;  %p57_p1 = scmp.eq.s32.totalorder %s2011_s29, 0 }
  0x13   : > { %p62_p2 = scmp.ne.s32.totalorder %s1995_s25, %s1991_s24  ;;  %p2564_p3 = scmp.eq.s32.totalorder %s2103_s30, 0 }
  0x14   : > { %p234_p4 = scmp.eq.s32.totalorder %s2103_s30, 1  ;;  %p2114_p5 = por %p57_p1, %p56_p0 }
  0x15   : > { %p240_p6 = scmp.eq.s32.totalorder %s1410_s8, 1  ;;  %p2120_p7 = por %p2564_p3, %p62_p2 }
  0x16   : > { %s2600_s10 = scalar_select %p2114_p5, 1, 0 }
  0x17   : > { %s2601_s11 = scalar_select %p2120_p7, 1, 0 }
  0x18   : > { %p2124_p8 = por %p234_p4, %p56_p0  ;;  %p2128_p9 = por %p240_p6, %p62_p2 }
  0x19   : > { %2602 = sst [smem:[#allocation25_spill]] %s2601_s11  ;;  %p1411_p10 = scmp.ge.s32.totalorder %s2011_s29, 1 }
  0x1a   : > { %s2603_s12 = scalar_select %p2124_p8, 1, 0 }
  0x1b   : > { %s2605_s13 = scalar_select %p2128_p9, 1, 0 }
  0x1c   : > { %2604 = sst [smem:[#allocation26_spill]] %s2603_s12  ;;  %p247_p11 = scmp.lt.s32.totalorder %s2011_s29, 3 }
  0x1d   : > { %2606 = sst [smem:[#allocation27_spill]] %s2605_s13  ;;  %s2013_s15 = smov [#allocation8]  }
  0x1e   : > { %p2134_p12 = pnand %p1411_p10, %p247_p11  ;;  %s259_s16 = sshll.u32 %s2013_s15, 4  ;;  %s260_s16 = int_to_ptr.vmem [resolvable:$true] %s259_s16 }
  0x1f   : > { %s40_s18 = sadd.s32 1, %s2007_s28  ;;  %s2610_s3 = sld [smem:[#allocation32_spill]] }
  0x20   : > { %s2607_s14 = scalar_select %p2134_p12, 1, 0 }
  0x21   : > { %p1596_p13 = pneg %p2134_p12  ;;  %p2148_p2 = scmp.ge.s32.totalorder %s40_s18, 2 }
  0x23   : > { %p2143_p1 = pnand %p1596_p13, %p2564_p3 }
  0x24   : > { %s2609_s19 = scalar_select %p2148_p2, 1, 0 }
  0x25   : > { %s2608_s17 = scalar_select %p2143_p1, 1, 0 }
  0x26   : > { %s1709_s22 = scalar_lea.hbm %s2610_s3, 256  ;;  %p2160_p6 = pneg %p2143_p1 }
  0x27   : > { %p1710_p4 = scmp.ne.s32.totalorder %s2610_s3, %s1709_s22  ;;  %p1716_p13 = scmp.lt.u32.totalorder %s1709_s22, %s2610_s3 }
  0x28   : > { %s2611_s15 = scalar_select %p2160_p6, 1, 0 }
  0x29   : > { %p1712_p10 = pnand %p2160_p6, %p1710_p4 }
  0x2b   : > { %p1713_p11 = pneg %p1712_p10 }
  0x2d   : > { %p1718_p0 = pnand %p1716_p13, %p1713_p11 }
  0x2f   : > { %1721 = shalt.err (!%p1718_p0)
}
  0x30   : > { %s1722_s20 = scalar_lea.vmem %s260_s16, 256  ;;  %p1730_p7 = scmp.lt.s32.totalorder %s260_s16, %s260_s16 }
  0x31   : > { %p1723_p3 = scmp.ne.s32.totalorder %s260_s16, %s1722_s20  ;;  %p1731_p12 = scmp.lt.s32.totalorder %s1722_s20, %s1722_s20 }
  0x33   : > { %p1725_p9 = pnand %p1723_p3, %p2160_p6  ;;  %p1732_p5 = por %p1731_p12, %p1730_p7 }
  0x35   : > { %p1726_p8 = pneg %p1725_p9 }
  0x37   : > { %p1733_p2 = pnand %p1732_p5, %p1726_p8 }
  0x39   : > { %1736 = shalt.err (!%p1733_p2)
}
  0x3a   : > { %s2572_s21 = smov 64   ;;  %s2574_s9 = smov 4  }
  0x3b   : > { %1599 = dma.hbm_to_vmem [thread:$0]  (!%p2143_p1), %s2610_s3, 256, %s260_s16, [#allocation9], %s2572_s21, %s2572_s21, %s2574_s9  }
  0x3c   : > { %p2612_p3 = scmp.ne.s32.totalorder %s2609_s19, 0  ;;  %p1626_p5 = scmp.lt.s32.totalorder %s2011_s29, 2 }
  0x3d   : > { %s2576_s23 = sand.u32 1, %s2011_s29   ;;  %s2573_s20 = sand.u32 1, %s1999_s26  }
  0x3e   : > { %s2661_s18 = smov (%p2612_p3, %s40_s18), 0  ;;  %s2190_s24 = sshll.u32 %s2573_s20, 5 }
  0x3f   : > { %2613 = sst [smem:[#allocation28_spill]] %s2661_s18  ;;  %s44_s8 = ssub.s32 %s2007_s28, %s2661_s18 }
  0x40   : > { %p47_p7 = scmp.eq.s32.totalorder %s44_s8, 0  ;;  %s2193_s7 = sshll.u32 %s2007_s28, 9 }
  0x41   : > { %s2614_s12 = sadd.s32 1, %s1999_s26  ;;  %s2616_s0 = sld [smem:[#allocation30_spill]] }
  0x42   : > { %s2198_s13 = scalar_select %p47_p7, %s1999_s26, %s2614_s12  }
  0x43   : > { %s305_s8 = scalar_lea.vmem [#allocation2], %s2190_s24  ;;  %p2617_p8 = scmp.ne.s32.totalorder %s2600_s10, 0 }
  0x44   : > { %2615 = sst [smem:[#allocation29_spill]] %s2198_s13  ;;  %s313_s21 = sshll.u32 %s305_s8, 4  ;;  %s2213_s21 = int_to_ptr.vmem [resolvable:$true] %s313_s21 }
  0x45   : > { %p2209_p9 = pnand %p1626_p5, %p2617_p8  ;;  %s2217_s12 = scalar_lea.sflag [#allocation3], %s2576_s23 }
  0x47   : > { %s2204_s22 = scalar_lea.hbm %s2616_s0, %s2193_s7  ;;  %p2223_p0 = pneg %p2209_p9 }
  0x48   : > { %s2618_s20 = scalar_select %p2209_p9, 1, 0 }
  0x49   : > { %s1737_s16 = scalar_lea.hbm %s2204_s22, 512  ;;  %s1742_s9 = scalar_lea.hbm %s2616_s0, 1024 }
  0x4a   : > { %p1738_p12 = scmp.ne.s32.totalorder %s2204_s22, %s1737_s16  ;;  %p1743_p10 = scmp.lt.u32.totalorder %s2204_s22, %s2616_s0 }
  0x4b   : > { %s2619_s19 = scalar_select %p2223_p0, 1, 0 }
  0x4c   : > { %p1740_p2 = pnand %p2223_p0, %p1738_p12  ;;  %p1744_p11 = scmp.lt.u32.totalorder %s1742_s9, %s1737_s16 }
  0x4d   : > { %p1746_p3 = scmp.lt.u32.totalorder %s1737_s16, %s2204_s22 }
  0x4e   : > { %p1741_p4 = pneg %p1740_p2  ;;  %p1745_p13 = por %p1744_p11, %p1743_p10 }
  0x50   : > { %p1747_p5 = por %p1746_p3, %p1745_p13 }
  0x52   : > { %p1748_p7 = pnand %p1747_p5, %p1741_p4 }
  0x54   : > { %1751 = shalt.err (!%p1748_p7)
}
  0x55   : > { %s1752_s23 = scalar_lea.vmem %s2213_s21, 512  ;;  %s2016_s10 = smov [#allocation2]  }
  0x56   : > { %p1753_p8 = scmp.ne.s32.totalorder %s2213_s21, %s1752_s23  ;;  %s1757_s8 = sshll.u32 %s2016_s10, 4  ;;  %s1758_s8 = int_to_ptr.vmem [resolvable:$false] %s1757_s8 }
  0x57   : > { %s1759_s3 = scalar_lea.vmem %s1758_s8, 1024  ;;  %p1760_p1 = scmp.lt.s32.totalorder %s2213_s21, %s1758_s8 }
  0x58   : > { %p1755_p12 = pnand %p1753_p8, %p2223_p0  ;;  %p1761_p6 = scmp.lt.s32.totalorder %s1759_s3, %s1752_s23 }
  0x5a   : > { %p1756_p2 = pneg %p1755_p12  ;;  %p1762_p10 = por %p1761_p6, %p1760_p1 }
  0x5c   : > { %p1763_p11 = pnand %p1762_p10, %p1756_p2 }
  0x5e   : > { %1766 = shalt.err (!%p1763_p11)
}
  0x5f   : > { %s2581_s18 = smov 128   ;;  %s2018_s9 = smov 8  }
  0x60   : > { %1609 = dma.hbm_to_vmem [thread:$0]  (!%p2209_p9), %s2204_s22, 512, %s2213_s21, %s2217_s12, %s2581_s18, %s2581_s18, %s2018_s9  }
  0x61   : > { %s2620_s1 = sld [smem:[#allocation31_spill]]  ;;  %s327_s8 = scalar_lea.vmem [#allocation5], %s2190_s24 }
  0x62   : > { %s334_s3 = sshll.u32 %s327_s8, 4  ;;  %s2621_s0 = sand.u32 1, %s2011_s29   ;;  %s2257_s3 = int_to_ptr.vmem [resolvable:$true] %s334_s3 }
  0x63   : > { %s2261_s13 = scalar_lea.sflag [#allocation6], %s2621_s0 }
  0x67   : > { %s2254_s10 = scalar_lea.hbm %s2620_s1, %s2193_s7  ;;  %s1772_s16 = scalar_lea.hbm %s2620_s1, 1024 }
  0x68   : > { %s1767_s27 = scalar_lea.hbm %s2254_s10, 512  ;;  %p1773_p13 = scmp.lt.u32.totalorder %s2254_s10, %s2620_s1 }
  0x69   : > { %p1768_p1 = scmp.ne.s32.totalorder %s2254_s10, %s1767_s27  ;;  %p1774_p3 = scmp.lt.u32.totalorder %s1772_s16, %s1767_s27 }
  0x6a   : > { %p1776_p7 = scmp.lt.u32.totalorder %s1767_s27, %s2254_s10 }
  0x6b   : > { %p1770_p6 = pnand %p1768_p1, %p2223_p0  ;;  %p1775_p5 = por %p1774_p3, %p1773_p13 }
  0x6d   : > { %p1771_p4 = pneg %p1770_p6  ;;  %p1777_p8 = por %p1776_p7, %p1775_p5 }
  0x6f   : > { %p1778_p12 = pnand %p1777_p8, %p1771_p4 }
  0x71   : > { %1781 = shalt.err (!%p1778_p12)
}
  0x72   : > { %s1782_s0 = scalar_lea.vmem %s2257_s3, 512  ;;  %s2019_s8 = smov [#allocation5]  }
  0x73   : > { %p1783_p2 = scmp.ne.s32.totalorder %s2257_s3, %s1782_s0  ;;  %s1787_s21 = sshll.u32 %s2019_s8, 4  ;;  %s1788_s21 = int_to_ptr.vmem [resolvable:$false] %s1787_s21 }
  0x74   : > { %s1789_s18 = scalar_lea.vmem %s1788_s21, 1024  ;;  %p1790_p1 = scmp.lt.s32.totalorder %s2257_s3, %s1788_s21 }
  0x75   : > { %p1785_p10 = pnand %p1783_p2, %p2223_p0  ;;  %p1791_p6 = scmp.lt.s32.totalorder %s1789_s18, %s1782_s0 }
  0x77   : > { %p1786_p11 = pneg %p1785_p10  ;;  %p1792_p13 = por %p1791_p6, %p1790_p1 }
  0x79   : > { %p1793_p3 = pnand %p1792_p13, %p1786_p11 }
  0x7b   : > { %1796 = shalt.err (!%p1793_p3)
}
  0x7c   : > { %s2622_s27 = smov 128   ;;  %s2020_s22 = smov [#allocation10]  }
  0x7d   : > { %1612 = dma.hbm_to_vmem [thread:$0]  (!%p2209_p9), %s2254_s10, 512, %s2257_s3, %s2261_s13, %s2622_s27, %s2622_s27, %s2018_s9  }
  0x7e   : > { %s272_s16 = sshll.u32 %s2020_s22, 4  ;;  %s2021_s23 = smov [#allocation11]   ;;  %s273_s16 = int_to_ptr.vmem [resolvable:$true] %s272_s16 }
  0x7f   : > { %s287_s8 = sshll.u32 %s2021_s23, 4  ;;  %s1797_s18 = scalar_lea.hbm %s2559_s4, 256  ;;  %s288_s8 = int_to_ptr.vmem [resolvable:$true] %s287_s8 }
  0x80   : > { %p1798_p4 = scmp.ne.s32.totalorder %s2559_s4, %s1797_s18  ;;  %p2623_p5 = scmp.ne.s32.totalorder %s2611_s15, 0 }
  0x81   : > { %p1804_p12 = scmp.lt.u32.totalorder %s1797_s18, %s2559_s4 }
  0x82   : > { %p1800_p7 = pnand %p1798_p4, %p2623_p5 }
  0x84   : > { %p1801_p8 = pneg %p1800_p7 }
  0x86   : > { %p1806_p2 = pnand %p1804_p12, %p1801_p8 }
  0x88   : > { %1809 = shalt.err (!%p1806_p2)
}
  0x89   : > { %s1810_s10 = scalar_lea.vmem %s273_s16, 256  ;;  %p1818_p6 = scmp.lt.s32.totalorder %s273_s16, %s273_s16 }
  0x8a   : > { %p1811_p10 = scmp.ne.s32.totalorder %s273_s16, %s1810_s10  ;;  %p1819_p13 = scmp.lt.s32.totalorder %s1810_s10, %s1810_s10 }
  0x8c   : > { %p1813_p11 = pnand %p1811_p10, %p2623_p5  ;;  %p1820_p3 = por %p1819_p13, %p1818_p6 }
  0x8e   : > { %p1814_p1 = pneg %p1813_p11 }
  0x90   : > { %p1821_p9 = pnand %p1820_p3, %p1814_p1 }
  0x92   : > { %1824 = shalt.err (!%p1821_p9)
}
  0x93   : > { %p2624_p4 = scmp.ne.s32.totalorder %s2608_s17, 0  ;;  %s2625_s1 = smov 4  }
  0x94   : > { %s2626_s29 = smov 64   ;;  %s1825_s23 = scalar_lea.hbm %s2560_s5, 512 }
  0x95   : > { %1602 = dma.hbm_to_vmem [thread:$0]  (!%p2624_p4), %s2559_s4, 256, %s273_s16, [#allocation9], %s2626_s29, %s2626_s29, %s2625_s1  }
  0x96   : > { %p1826_p7 = scmp.ne.s32.totalorder %s2560_s5, %s1825_s23  ;;  %p1832_p12 = scmp.lt.u32.totalorder %s1825_s23, %s2560_s5 }
  0x98   : > { %p1828_p9 = pnand %p1826_p7, %p2623_p5 }
  0x9a   : > { %p1829_p8 = pneg %p1828_p9 }
  0x9c   : > { %p1834_p2 = pnand %p1832_p12, %p1829_p8 }
  0x9e   : > { %1837 = shalt.err (!%p1834_p2)
}
  0x9f   : > { %s1838_s25 = scalar_lea.vmem %s288_s8, 512  ;;  %p1846_p6 = scmp.lt.s32.totalorder %s288_s8, %s288_s8 }
  0xa0   : > { %p1839_p10 = scmp.ne.s32.totalorder %s288_s8, %s1838_s25  ;;  %p1847_p13 = scmp.lt.s32.totalorder %s1838_s25, %s1838_s25 }
  0xa2   : > { %p1841_p11 = pnand %p1839_p10, %p2623_p5  ;;  %p1848_p3 = por %p1847_p13, %p1846_p6 }
  0xa4   : > { %p1842_p1 = pneg %p1841_p11 }
  0xa6   : > { %p1849_p0 = pnand %p1848_p3, %p1842_p1 }
  0xa8   : > { %1852 = shalt.err (!%p1849_p0)
}
  0xa9   : > { %1605 = dma.hbm_to_vmem [thread:$0]  (!%p2624_p4), %s2560_s5, 512, %s288_s8, [#allocation12], %s2622_s27, %s2622_s27, %s2018_s9  }
  0xaa   : > { %s2334_s11 = scalar_lea.hbm %s2557_s2, %s2193_s7  ;;  %s348_s17 = scalar_lea.vmem [#allocation7], %s2190_s24 }
  0xab   : > { %s355_s3 = sshll.u32 %s348_s17, 4  ;;  %s1853_s22 = scalar_lea.hbm %s2334_s11, 512  ;;  %s2337_s3 = int_to_ptr.vmem [resolvable:$true] %s355_s3 }
  0xac   : > { %p1854_p0 = scmp.ne.s32.totalorder %s2334_s11, %s1853_s22  ;;  %p2627_p5 = scmp.ne.s32.totalorder %s2619_s19, 0 }
  0xad   : > { %s1858_s21 = scalar_lea.hbm %s2557_s2, 1024  ;;  %p1859_p4 = scmp.lt.u32.totalorder %s2334_s11, %s2557_s2 }
  0xae   : > { %p1856_p7 = pnand %p1854_p0, %p2627_p5  ;;  %p1860_p8 = scmp.lt.u32.totalorder %s1858_s21, %s1853_s22 }
  0xaf   : > { %p1862_p2 = scmp.lt.u32.totalorder %s1853_s22, %s2334_s11 }
  0xb0   : > { %p1857_p9 = pneg %p1856_p7  ;;  %p1861_p12 = por %p1860_p8, %p1859_p4 }
  0xb2   : > { %p1863_p10 = por %p1862_p2, %p1861_p12 }
  0xb4   : > { %p1864_p11 = pnand %p1863_p10, %p1857_p9 }
  0xb6   : > { %1867 = shalt.err (!%p1864_p11)
}
  0xb7   : > { %s1868_s24 = scalar_lea.vmem %s2337_s3, 512  ;;  %s2022_s18 = smov [#allocation7]  }
  0xb8   : > { %p1869_p1 = scmp.ne.s32.totalorder %s2337_s3, %s1868_s24  ;;  %s1873_s10 = sshll.u32 %s2022_s18, 4  ;;  %s1874_s10 = int_to_ptr.vmem [resolvable:$false] %s1873_s10 }
  0xb9   : > { %s1875_s25 = scalar_lea.vmem %s1874_s10, 1024  ;;  %p1876_p3 = scmp.lt.s32.totalorder %s2337_s3, %s1874_s10 }
  0xba   : > { %p1871_p6 = pnand %p1869_p1, %p2627_p5  ;;  %p1877_p0 = scmp.lt.s32.totalorder %s1875_s25, %s1868_s24 }
  0xbc   : > { %p1872_p13 = pneg %p1871_p6  ;;  %p1878_p7 = por %p1877_p0, %p1876_p3 }
  0xbe   : > { %p1879_p4 = pnand %p1878_p7, %p1872_p13 }
  0xc0   : > { %1882 = shalt.err (!%p1879_p4)
}
  0xc1   : > { %p2628_p9 = scmp.ne.s32.totalorder %s2618_s20, 0  ;;  %s1425_s16 = sshll.u32 %s2007_s28, 4 }
  0xc2   : > { %s2629_s1 = sand.u32 1, %s1999_s26   ;;  %s373_s23 = scalar_lea.hbm %s2561_s6, %s1425_s16 }
  0xc3   : > { %1615 = dma.hbm_to_vmem [thread:$0]  (!%p2628_p9), %s2334_s11, 512, %s2337_s3, %s2261_s13, %s2622_s27, %s2622_s27, %s2018_s9  }
  0xc4   : > { %s368_s15 = scalar_lea.vmem [#allocation13], %s2629_s1  ;;  %s1883_s8 = scalar_lea.hbm %s373_s23, 16 }
  0xc5   : > { %s375_s29 = sshll.u32 %s368_s15, 4  ;;  %p1884_p8 = scmp.ne.s32.totalorder %s373_s23, %s1883_s8  ;;  %s376_s29 = int_to_ptr.vmem [resolvable:$true] %s375_s29 }
  0xc6   : > { %s1888_s7 = scalar_lea.hbm %s2561_s6, 32  ;;  %p1889_p10 = scmp.lt.u32.totalorder %s373_s23, %s2561_s6 }
  0xc7   : > { %p1886_p12 = pnand %p1884_p8, %p2627_p5  ;;  %p1890_p11 = scmp.lt.u32.totalorder %s1888_s7, %s1883_s8 }
  0xc8   : > { %p1892_p6 = scmp.lt.u32.totalorder %s1883_s8, %s373_s23 }
  0xc9   : > { %p1887_p2 = pneg %p1886_p12  ;;  %p1891_p1 = por %p1890_p11, %p1889_p10 }
  0xcb   : > { %p1893_p13 = por %p1892_p6, %p1891_p1 }
  0xcd   : > { %p1894_p3 = pnand %p1893_p13, %p1887_p2 }
  0xcf   : > { %1897 = shalt.err (!%p1894_p3)
}
  0xd0   : > { %s1898_s9 = scalar_lea.vmem %s376_s29, 16  ;;  %s2023_s27 = smov [#allocation13]  }
  0xd1   : > { %p1899_p0 = scmp.ne.s32.totalorder %s376_s29, %s1898_s9  ;;  %s1903_s11 = sshll.u32 %s2023_s27, 4  ;;  %s1904_s11 = int_to_ptr.vmem [resolvable:$false] %s1903_s11 }
  0xd2   : > { %s1905_s3 = scalar_lea.vmem %s1904_s11, 32  ;;  %p1906_p8 = scmp.lt.s32.totalorder %s376_s29, %s1904_s11 }
  0xd3   : > { %p1901_p7 = pnand %p1899_p0, %p2627_p5  ;;  %p1907_p12 = scmp.lt.s32.totalorder %s1905_s3, %s1898_s9 }
  0xd5   : > { %p1902_p4 = pneg %p1901_p7  ;;  %p1908_p9 = por %p1907_p12, %p1906_p8 }
  0xd7   : > { %p1909_p10 = pnand %p1908_p9, %p1902_p4 }
  0xd9   : > { %1912 = shalt.err (!%p1909_p10)
}
  0xda   : > { %p2630_p11 = scmp.ne.s32.totalorder %s2618_s20, 0  ;;  %p2631_p2 = scmp.ne.s32.totalorder %s2607_s14, 0 }
  0xdb   : > { %s2632_s19 = sld [smem:[#allocation22_spill]] (!%p2631_p2)  ;;  %s2633_s18 = sld [smem:[#allocation25_spill]] (!%p2631_p2) }
  0xdc   : > { %1618 = dma.hbm_to_vmem [thread:$0]  (!%p2630_p11), %s373_s23, 16, %s376_s29, %s2217_s12  }
  0xdd   : > { %384 = sbr.rel (%p2631_p2) target bundleno = 1138 (0x472), region = 48  ;;  %s386_s10 = sand.u32 (!%p2631_p2), 1, %s2103_s30  }
  0xde   : > { %s387_s1 = scalar_lea.sflag (!%p2631_p2), [#allocation3], %s386_s10 }
  0xe1   : > { %s2387_s25 = sand.u32 (!%p2631_p2), 1, %s2632_s19   ;;  %p2634_p5 = scmp.ne.s32.totalorder (!%p2631_p2), %s2633_s18, 0 }
  0xe2   : > { %s1427_s16 = sshll.u32 (!%p2631_p2), %s2387_s25, 5 }
  0xe3   : > { %s2390_s15 = scalar_lea.vmem (!%p2631_p2), [#allocation2], %s1427_s16 }
  0xe4   : > { %1966 = dma.done.wait (%p2634_p5), %s387_s1, 512  }
  0xe5   : > { %1968 = vsyncadd (%p2634_p5), %s387_s1, 4294966784  ;;  %s396_s20 = scalar_lea.sflag [#allocation6], %s386_s10  ;;  %s399_s14 = scalar_lea.vmem [#allocation5], %s1427_s16 }
  0xe6   : > { %1970 = dma.done.wait (%p2634_p5), %s396_s20, 1024  }
  0xe7   : > { %1972 = vsyncadd (%p2634_p5), %s396_s20, 4294966272  ;;  %s2400_s12 = scalar_lea.vmem [#allocation7], %s1427_s16  ;;  %p2635_p9 = scmp.eq.s32.totalorder %s2103_s30, 0 }
  0xe9   : > { %1974 = dma.done.wait (%p2635_p9), [#allocation9], 512   ;;  %p2636_p1 = pmov %p2635_p9 }
  0xeb   : > { %1976 = vsyncadd (%p2636_p1), [#allocation9], 4294966784  ;;  %p2637_p6 = pmov %p2636_p1 }
  0xec   : > { %p2638_p13 = pmov %p2636_p1 }
  0xed   : > { %1978 = dma.done.wait (%p2637_p6), [#allocation12], 512  }
  0xee   : > { %1980 = vsyncadd (%p2638_p13), [#allocation12], 4294966784  ;;  %s428_s29 = scalar_lea.vmem [#allocation13], %s2387_s25 }
  0xef   : > { %1982 = dma.done.wait (%p2634_p5), %s387_s1, 16  }
  0xf0   : > { %1984 = vsyncadd (%p2634_p5), %s387_s1, 4294967280  ;;  %v2024_v0 = vmov 0.0|0.0   ;;  %vm2025_vm0 = vmmov 0   ;;  %v2026_v1 = vmov 0.0   ;;  %v481_v2 = vld [vmem:[#allocation8] sm:$0xf] }
  0xf1   : > { %1542 = vmatprep.subr.bf16.mxu0 %v2024_v0  ;;  %1546 = vmatprep.subr.bf16.mxu1 %v2024_v0  ;;  %v485_v3 = vld [vmem:[%s399_s14] sm:$0xff]  ;;  %vm501_vm1 = vcmask 1043456   ;;  %vm534_vm2 = vcmask 64512   ;;  %v486_v6 = vld [vmem:[%s399_s14 + $0x8] sm:$0xff]  ;;  %v487_v8 = vld [vmem:[%s399_s14 + $0x10] sm:$0xff]  ;;  %vm858_vm4 = vcmask 97280  }
  0xf2   : > { %1490 = vmatprep.mubr.msk.f32.mxu0 %vm2025_vm0, %v2026_v1  ;;  %1497 = vmatprep.mubr.msk.f32.mxu1 %vm2025_vm0, %v2026_v1  ;;  %v493_v4 = vrot.slane %v485_v3, 4  ;;  %v482_v5 = vld [vmem:[#allocation8 + $0x4] sm:$0xf]  ;;  %v494_v7 = vrot.slane %v486_v6, 4  ;;  %v488_v9 = vld [vmem:[%s399_s14 + $0x18] sm:$0xff]  ;;  %vm2424_vm3 = vmpackc.low %vm534_vm2, %vm534_vm2  ;;  %v495_v12 = vrot.slane %v487_v8, 4 }
  0xf3   : > { %v483_v15 = vld [vmem:[#allocation8 + $0x8] sm:$0xf]  ;;  %v496_v16 = vrot.slane %v488_v9, 4  ;;  %v484_v18 = vld [vmem:[#allocation8 + $0xc] sm:$0xf]  ;;  %v473_v19 = vld [vmem:[%s2390_s15] sm:$0xff] }
  0xf4   : > { %v502_v10 = vsel %vm501_vm1, %v481_v2, %v493_v4  ;;  %v503_v14 = vsel %vm501_vm1, %v482_v5, %v494_v7  ;;  %v504_v20 = vsel %vm501_vm1, %v483_v15, %v495_v12  ;;  %v474_v21 = vld [vmem:[%s2390_s15 + $0x8] sm:$0xff]  ;;  %v477_v23 = vmul.f32 0.35355338, %v473_v19  ;;  %v475_v27 = vld [vmem:[%s2390_s15 + $0x10] sm:$0xff]  ;;  %v476_v28 = vld [vmem:[%s2390_s15 + $0x18] sm:$0xff]  ;;  %s2643_s30 = sld [smem:[#allocation23_spill]] }
  0xf5   : > { %v1543_v13 = vpack.c.bf16 %v493_v4, %v502_v10  ;;  %v1547_v17 = vpack.c.bf16 %v494_v7, %v503_v14  ;;  %v505_v22 = vsel %vm501_vm1, %v484_v18, %v496_v16  ;;  %v1551_v24 = vpack.c.bf16 %v495_v12, %v504_v20  ;;  %v530_v31 = vld [vmem:[#allocation11] sm:$0xff]  ;;  %v531_v32 = vld [vmem:[#allocation11 + $0x8] sm:$0xff]  ;;  %v532_v43 = vld [vmem:[#allocation11 + $0x10] sm:$0xff]  ;;  %s2028_s17 = smov 8   ;;  %s2029_s22 = smov 16  }
  0xf6   : > { %v478_v25 = vmul.f32 0.35355338, %v474_v21  ;;  %v1555_v26 = vpack.c.bf16 %v496_v16, %v505_v22  ;;  %v479_v29 = vmul.f32 0.35355338, %v475_v27  ;;  %v480_v30 = vmul.f32 0.35355338, %v476_v28 }
  0xf7   : > { %1545 = vmatpush3.bf16.xpose.msk.msra.mxu0 %vm2424_vm3, %v1543_v13  ;;  %1549 = vmatpush3.bf16.xpose.msk.msra.mxu1 %vm2424_vm3, %v1547_v17  ;;  %v1446_v34 = vld [vmem:[%s428_s29] ss:$0 sm:$0xff]  ;;  %v533_v45 = vld [vmem:[#allocation11 + $0x18] sm:$0xff]  ;;  %v506_v16 = vld [vmem:[#allocation10] sm:$0xf]  ;;  %vm2027_vm5 = vmmov 1  }
  0xf8   : > { %1550 = vmatprep.subr.bf16.mxu0 %v2024_v0  ;;  %1554 = vmatprep.subr.bf16.mxu1 %v2024_v0  ;;  %v510_v14 = vld [vmem:[%s2400_s12] sm:$0xff]  ;;  %v511_v19 = vld [vmem:[%s2400_s12 + $0x8] sm:$0xff]  ;;  %vm2473_vm6 = vmpackc.low %vm501_vm1, %vm2027_vm5  ;;  %s2030_s23 = smov 24   ;;  %s1433_s8 = sshll.u32 %s2387_s25, 3  ;;  %vm1216_vm7 = vcmask 130048   ;;  %vm1218_vm8 = vcmask 195584  }
  0xf9   : > { %v518_v15 = vrot.slane %v510_v14, 4  ;;  %v519_v21 = vrot.slane %v511_v19, 4  ;;  %v507_v22 = vld [vmem:[#allocation10 + $0x4] sm:$0xf]  ;;  %s2644_s21 = sld [smem:[#allocation26_spill]]  ;;  %s472_s7 = scalar_lea.vmem [#allocation14], %s1433_s8 }
  0xfa   : > { %s1456_s0 = sshll.u32 %s2643_s30, 7  ;;  %s1237_s24 = sshll.u32 %s472_s7, 4  ;;  %vm1220_vm9 = vcmask 261120   ;;  %s2508_s24 = int_to_ptr.vmem [resolvable:$true] %s1237_s24 }
  0xfb   : > { %v526_v17 = vsel %vm501_vm1, %v506_v16, %v518_v15  ;;  %s2645_s27 = sld [smem:[#allocation33_spill]]  ;;  %s1223_s19 = scalar_lea.sflag [#allocation4], %s2387_s25 }
  0xfc   : > { %v1559_v18 = vpack.c.bf16 %v518_v15, %v526_v17  ;;  %s1913_s18 = scalar_lea.vmem %s2508_s24, 128  ;;  %s2031_s10 = smov [#allocation14]  }
  0xfd   : > { %p1914_p3 = scmp.ne.s32.totalorder %s2508_s24, %s1913_s18  ;;  %s1917_s16 = sshll.u32 %s2031_s10, 4  ;;  %s1918_s16 = int_to_ptr.vmem [resolvable:$false] %s1917_s16 }
  0xfe   : > { %1491 = vmatmul.mubr.msk.f32.vlgmr.msra.gmra.mrb[0].mxu0 %vm534_vm2, %v477_v23  ;;  %1498 = vmatmul.mubr.msk.f32.vlgmr.msra.gmra.mrb[0].mxu1 %vm534_vm2, %v478_v25  ;;  %v527_v23 = vsel %vm501_vm1, %v507_v22, %v519_v21  ;;  %s1919_s1 = scalar_lea.vmem %s1918_s16, 256  ;;  %p1920_p8 = scmp.lt.s32.totalorder %s2508_s24, %s1918_s16 }
  0xff   : > { %1553 = vmatpush3.bf16.xpose.msk.msra.mxu0 %vm2424_vm3, %v1551_v24  ;;  %1557 = vmatpush3.bf16.xpose.msk.msra.mxu1 %vm2424_vm3, %v1555_v26  ;;  %v1563_v24 = vpack.c.bf16 %v519_v21, %v527_v23  ;;  %v512_v26 = vld [vmem:[%s2400_s12 + $0x10] sm:$0xff]  ;;  %p2647_p0 = scmp.ne.s32.totalorder %s2644_s21, 0  ;;  %p1921_p12 = scmp.lt.s32.totalorder %s1919_s1, %s1913_s18 }
 0x100   : > { %1504 = vmatprep.mubr.msk.f32.mxu0 %vm2025_vm0, %v2026_v1  ;;  %1511 = vmatprep.mubr.msk.f32.mxu1 %vm2025_vm0, %v2026_v1  ;;  %v520_v28 = vrot.slane %v512_v26, 4 }
 0x101   : > { %1558 = vmatprep.subr.bf16.mxu0 %v2024_v0  ;;  %1562 = vmatprep.subr.bf16.mxu1 %v2024_v0  ;;  %s2646_s11 = smov %s2645_s27  ;;  %s2506_s3 = scalar_lea.hbm %s2645_s27, %s1456_s0 }
 0x102   : > { %p1915_p7 = pnand %p1914_p3, %p2647_p0  ;;  %p1922_p10 = por %p1921_p12, %p1920_p8 }
 0x104   : > { %p1916_p4 = pneg %p1915_p7 }
 0x106   : > { %1505 = vmatmul.mubr.msk.f32.vlgmr.msra.gmra.mrb[2].mxu0 %vm534_vm2, %v479_v29  ;;  %1512 = vmatmul.mubr.msk.f32.vlgmr.msra.gmra.mrb[2].mxu1 %vm534_vm2, %v480_v30  ;;  %v508_v29 = vld [vmem:[#allocation10 + $0x8] sm:$0xf]  ;;  %p1923_p11 = pnand %p1922_p10, %p1916_p4 }
 0x107   : > { %1518 = vmatprep.mubr.msk.f32.mxu0 %vm2025_vm0, %v2026_v1  ;;  %1525 = vmatprep.mubr.msk.f32.mxu1 %vm2025_vm0, %v2026_v1  ;;  %v513_v30 = vld [vmem:[%s2400_s12 + $0x18] sm:$0xff] }
 0x108   : > { %1561 = vmatpush3.bf16.msk.msra.mxu0 %vm2473_vm6, %v1559_v18  ;;  %1565 = vmatpush3.bf16.msk.msra.mxu1 %vm2473_vm6, %v1563_v24 }
 0x109   : > { %1566 = vmatprep.subr.bf16.mxu0 %v2024_v0  ;;  %1570 = vmatprep.subr.bf16.mxu1 %v2024_v0 }
 0x1d1   : > { %v609_v33 = vpop.f32.mrb[0].mxu0  ;;  %v687_v37 = vpop.f32.mrb[0].mxu1 }
 0x1d2   : > { %v610_v35 = vadd.f32 %v609_v33, %v530_v31  ;;  %v1492_v36 = vpop.f32.mrb[1].mxu0  ;;  %v688_v38 = vadd.f32 %v687_v37, %v531_v32  ;;  %v1499_v39 = vpop.f32.mrb[1].mxu1  ;;  %v528_v32 = vsel %vm501_vm1, %v508_v29, %v520_v28  ;;  %v521_v33 = vrot.slane %v513_v30, 4 }
 0x1d3   : > { %v1567_v36 = vpack.c.bf16 %v520_v28, %v528_v32 }
 0x1d4   : > { %v854_v40 = vadd.f32 %v1446_v34, %v610_v35  ;;  %v855_v41 = vadd.f32 %v1446_v34, %v688_v38 }
 0x1d6   : > { %v859_v42 = vsel %vm858_vm4, %v854_v40, -inf  ;;  %v862_v44 = vsel %vm858_vm4, %v855_v41, -inf }
 0x1d7   : > { %860 = vmax.xlane.f32.xlu0 %v859_v42 }
 0x1d9   : > { %v765_v46 = vpop.f32.mrb[2].mxu0  ;;  %v843_v49 = vpop.f32.mrb[2].mxu1 }
 0x1da   : > { %v766_v47 = vadd.f32 %v765_v46, %v532_v43  ;;  %v1506_v48 = vpop.f32.mrb[3].mxu0  ;;  %v844_v50 = vadd.f32 %v843_v49, %v533_v45  ;;  %v1513_v51 = vpop.f32.mrb[3].mxu1 }
 0x1db   : > { %863 = vmax.xlane.f32.xlu0 %v862_v44 }
 0x1dc   : > { %v856_v52 = vadd.f32 %v1446_v34, %v766_v47  ;;  %v857_v53 = vadd.f32 %v1446_v34, %v844_v50  ;;  %v509_v34 = vld [vmem:[#allocation10 + $0xc] sm:$0xf] }
 0x1dd   : > { %v529_v0 = vsel %vm501_vm1, %v509_v34, %v521_v33 }
 0x1de   : > { %v865_v54 = vsel %vm858_vm4, %v856_v52, -inf  ;;  %v868_v55 = vsel %vm858_vm4, %v857_v53, -inf }
 0x1df   : > { %866 = vmax.xlane.f32.xlu1 %v865_v54 }
 0x1e3   : > { %869 = vmax.xlane.f32.xlu1 %v868_v55 }
 0x264   : > { %v861_v56 = vpop.xlane.xlu0 %860 }
 0x265   : > { %v871_v57 = vsub.f32 %v854_v40, %v861_v56  ;;  %v1571_v40 = vpack.c.bf16 %v521_v33, %v529_v0 }
 0x267   : > { %v875_v58 = vmul.f32 1.442695, %v871_v57 }
 0x268   : > { %v864_v59 = vpop.xlane.xlu0 %863 }
 0x269   : > { %1693 = vpow2.f32 %v875_v58  ;;  %v872_v60 = vsub.f32 %v855_v41, %v864_v59 }
 0x26b   : > { %v877_v61 = vmul.f32 1.442695, %v872_v60 }
 0x26c   : > { %v867_v62 = vpop.xlane.xlu1 %866 }
 0x26d   : > { %1695 = vpow2.f32 %v877_v61  ;;  %v873_v63 = vsub.f32 %v856_v52, %v867_v62 }
 0x26f   : > { %v879_v2 = vmul.f32 1.442695, %v873_v63 }
 0x270   : > { %v870_v3 = vpop.xlane.xlu1 %869 }
 0x271   : > { %1697 = vpow2.f32 %v879_v2  ;;  %v874_v4 = vsub.f32 %v857_v53, %v870_v3 }
 0x273   : > { %v1694_v5 = vpop.eup %1693  ;;  %v881_v6 = vmul.f32 1.442695, %v874_v4 }
 0x274   : > { %v883_v7 = vsel %vm858_vm4, %v1694_v5, 0.0 }
 0x275   : > { %1699 = vpow2.f32 %v881_v6  ;;  %884 = vadd.xlane.f32.xlu0 %v883_v7 }
 0x277   : > { %v1696_v8 = vpop.eup %1695 }
 0x278   : > { %v886_v9 = vsel %vm858_vm4, %v1696_v8, 0.0 }
 0x279   : > { %887 = vadd.xlane.f32.xlu1 %v886_v9 }
 0x27b   : > { %v1698_v10 = vpop.eup %1697 }
 0x27c   : > { %v889_v11 = vsel %vm858_vm4, %v1698_v10, 0.0 }
 0x27d   : > { %890 = vadd.xlane.f32.xlu0 %v889_v11 }
 0x27f   : > { %v1700_v12 = vpop.eup %1699 }
 0x280   : > { %v892_v13 = vsel %vm858_vm4, %v1700_v12, 0.0 }
 0x281   : > { %893 = vadd.xlane.f32.xlu1 %v892_v13 }
 0x302   : > { %v885_v25 = vpop.xlane.xlu0 %884 }
 0x303   : > { %1701 = vrcp.f32 %v885_v25 }
 0x306   : > { %v888_v27 = vpop.xlane.xlu1 %887 }
 0x307   : > { %1703 = vrcp.f32 %v888_v27 }
 0x30a   : > { %v891_v31 = vpop.xlane.xlu0 %890 }
 0x30b   : > { %1705 = vrcp.f32 %v891_v31 }
 0x30d   : > { %v1702_v35 = vpop.eup %1701 }
 0x30e   : > { %v899_v37 = vmul.f32 %v1702_v35, %v1694_v5  ;;  %v894_v38 = vpop.xlane.xlu1 %893 }
 0x30f   : > { %1707 = vrcp.f32 %v894_v38 }
 0x310   : > { %1519 = vmatmul.mubr.msk.f32.vlgmr.msra.gmra.mrb[4].mxu0 %vm858_vm4, %v899_v37 }
 0x311   : > { %v1704_v39 = vpop.eup %1703  ;;  %1569 = vmatpush3.bf16.msk.msra.mxu0 %vm2473_vm6, %v1567_v36  ;;  %1532 = vmatprep.mubr.msk.f32.mxu0 %vm2025_vm0, %v2026_v1 }
 0x312   : > { %v900_v41 = vmul.f32 %v1704_v39, %v1696_v8 }
 0x314   : > { %1526 = vmatmul.mubr.msk.f32.vlgmr.msra.gmra.mrb[4].mxu1 %vm858_vm4, %v900_v41 }
 0x315   : > { %v1706_v42 = vpop.eup %1705  ;;  %1573 = vmatpush3.bf16.msk.msra.mxu1 %vm2473_vm6, %v1571_v40  ;;  %1539 = vmatprep.mubr.msk.f32.mxu1 %vm2025_vm0, %v2026_v1 }
 0x316   : > { %v901_v43 = vmul.f32 %v1706_v42, %v1698_v10 }
 0x318   : > { %1533 = vmatmul.mubr.msk.f32.vlgmr.msra.gmra.mrb[6].mxu0 %vm858_vm4, %v901_v43 }
 0x319   : > { %v1708_v44 = vpop.eup %1707 }
 0x31a   : > { %v902_v45 = vmul.f32 %v1708_v44, %v1700_v12 }
 0x31c   : > { %1540 = vmatmul.mubr.msk.f32.vlgmr.msra.gmra.mrb[6].mxu1 %vm858_vm4, %v902_v45 }
 0x3e3   : > { %v974_v46 = vpop.f32.mrb[4].mxu0 }
 0x3e4   : > { %v1520_v47 = vpop.f32.mrb[5].mxu0 }
 0x3e7   : > { %v1049_v48 = vpop.f32.mrb[4].mxu1 }
 0x3e8   : > { %1204 = vrot.lane.b32.xlu0 %v1049_v48, %s2028_s17  ;;  %v1527_v49 = vpop.f32.mrb[5].mxu1 }
 0x3eb   : > { %v1124_v50 = vpop.f32.mrb[6].mxu0 }
 0x3ec   : > { %1208 = vrot.lane.b32.xlu1 %v1124_v50, %s2029_s22  ;;  %v1534_v51 = vpop.f32.mrb[7].mxu0 }
 0x3ef   : > { %v1199_v1 = vpop.f32.mrb[6].mxu1 }
 0x3f0   : > { %v1541_v52 = vpop.f32.mrb[7].mxu1  ;;  %1212 = vrot.lane.b32.xlu1 %v1199_v1, %s2030_s23 }
 0x45a   : > { %v1205_v53 = vpop.permute.xlu0 %1204 }
 0x45b   : > { %v1215_v55 = vsel %vm534_vm2, %v974_v46, %v1205_v53 }
 0x45e   : > { %v1209_v54 = vpop.permute.xlu1 %1208 }
 0x45f   : > { %v1217_v56 = vsel %vm1216_vm7, %v1215_v55, %v1209_v54 }
 0x462   : > { %v1213_v57 = vpop.permute.xlu1 %1212 }
 0x463   : > { %v1219_v58 = vsel %vm1218_vm8, %v1217_v56, %v1213_v57 }
 0x464   : > { %1221 = vst.msk [vmem:[%s472_s7] sm:$0xff] %vm1220_vm9, %v1219_v58 }
 0x465   : > { %1926 = shalt.err (!%p1923_p11)
}
 0x466   : > { %s1927_s25 = scalar_lea.hbm %s2506_s3, 128  ;;  %s1931_s14 = scalar_lea.hbm %s2646_s11, 256 }
 0x467   : > { %p1928_p2 = scmp.ne.s32.totalorder %s2506_s3, %s1927_s25  ;;  %p1932_p1 = scmp.lt.u32.totalorder %s2506_s3, %s2646_s11 }
 0x468   : > { %p1933_p6 = scmp.lt.u32.totalorder %s1931_s14, %s1927_s25  ;;  %p1935_p3 = scmp.lt.u32.totalorder %s1927_s25, %s2506_s3 }
 0x469   : > { %p1929_p5 = pnand %p1928_p2, %p2647_p0 }
 0x46a   : > { %p1934_p13 = por %p1933_p6, %p1932_p1 }
 0x46b   : > { %p1930_p9 = pneg %p1929_p5 }
 0x46c   : > { %p1936_p7 = por %p1935_p3, %p1934_p13 }
 0x46e   : > { %p1937_p4 = pnand %p1936_p7, %p1930_p9 }
 0x470   : > { %1940 = shalt.err (!%p1937_p4)
}
 0x471   : > { %1594 = dma.vmem_to_hbm [thread:$0]  (%p2647_p0), %s2508_s24, 128, %s2506_s3, %s1223_s19  }
 0x472 PF: > { %s2648_s30 = sld [smem:[#allocation21_spill]]  ;;  %s2649_s17 = sld [smem:[#allocation27_spill]] }
 0x473   : > { %s2650_s22 = sld [smem:[#allocation24_spill]] }
 0x478   : > { %s1249_s23 = sand.u32 1, %s2648_s30   ;;  %p2651_p8 = scmp.ne.s32.totalorder %s2649_s17, 0 }
 0x479   : > { %p2652_p12 = scmp.ge.s32.totalorder %s2650_s22, 2  ;;  %s1250_s8 = scalar_lea.sflag [#allocation4], %s1249_s23 }
 0x47b   : > { %p1620_p10 = pnand %p2652_p12, %p2651_p8 }
 0x47d   : > { %1986 = dma.done.wait (!%p1620_p10), %s1250_s8, 128  }
 0x47e   : > { %1988 = vsyncadd (!%p1620_p10), %s1250_s8, 4294967168  ;;  %s28_s29 = sadd.s32 1, %s2650_s22   ;;  %s2653_s24 = sld [smem:[#allocation22_spill]] }
 0x47f   : > { %p25_p11 = scmp.ge.s32.totalorder %s28_s29, 4   ;;  %s2654_s21 = sld [smem:[#allocation29_spill]] }
 0x480   : > { %s2655_s0 = sld [smem:[#allocation28_spill]]  ;;  %s2656_s25 = smov %s1999_s26 }
 0x481   : > { %s2658_s27 = smov %s2007_s28  ;;  %27 = sbr.rel (!%p25_p11) target bundleno = 15 (0xf), region = 141 }
 0x485   : > { %s2657_s26 = smov %s2654_s21 }
 0x486   : > { %s2659_s28 = smov %s2655_s0 }
 0x488   :  { %1255 = vsyncpa [#allocation3], 1 }
 0x489   :  { %1257 = vsyncpa [#allocation3 + $0x1], 1 }
 0x48a   :  { %1258 = vsyncpa [#allocation6], 1 }
 0x48b   :  { %1260 = vsyncpa [#allocation6 + $0x1], 1 }
 0x48c   :  { %1261 = vsyncpa [#allocation9], 1 }
 0x48d   :  { %1262 = vsyncpa [#allocation12], 1 }
 0x48e   :  { %1263 = vsyncpa [#allocation4], 1 }
 0x48f   :  { %1265 = vsyncpa [#allocation4 + $0x1], 1 }

</bundles_post_ra>
